<compile_context>
chip_gen: v7x
topology: tpu7x:2x2x1
jax: 0.10.0
libtpu: 0.0.40
codegen_flags: <defaults>
</compile_context>

<pallas_src>
import functools

import jax
import jax.numpy as jnp
from jax.experimental import pallas as pl
from jax.experimental.pallas import tpu as pltpu


def _round_up(x, m):
    return ((x + m - 1) // m) * m


def _nbytes(shape, dtype):
    n = 1
    for s in shape:
        n *= int(s)
    return n * jnp.dtype(dtype).itemsize


# ----------------------------------------------------------------------------
# Kernel
# ----------------------------------------------------------------------------
def _message_layer_kernel(
    blk_tbl_ref,        # SMEM [node_tiles*max_blk] int32 (used by index_maps only)
    x_ref,              # [TN, HP]   f32   node tile (resident across edge axis)
    src_ref,            # [TE, HP]   mxu   x[edge_index[0]] for this edge block
    ea_ref,             # [TE, EDp]  mxu   edge attributes
    tgt_row_ref,        # [1, TE]    int32 target node ids (lane layout, -1 = pad)
    tgt_col_ref,        # [TE, 1]    int32 target node ids (sublane layout)
    w_msg_ref,          # [3*HP+EDp, HP] mxu  packed: w_m1_src | w_m1_tgt | w_m2 | w_m1_edge
    b_msg_ref,          # [2, HP]    f32      packed: b_m1 | b_m2
    w_upd_ref,          # [5*HP, HP] mxu      packed: w_gx | w_ga | w_u1x | w_u1a | w_u2
    v_upd_ref,          # [5, HP]    f32      packed: b_g | b_u1 | b_u2 | gamma | beta
    out_ref,            # [TN, HP]   f32
    acc_ref,            # VMEM scratch [TN, HP] f32 (aggregated messages)
    *, hidden_dim, hp, edp, tile_n, mxu_dtype,
):
    del blk_tbl_ref
    n = pl.program_id(0)
    e = pl.program_id(1)
    tn = tile_n
    te = src_ref.shape[0]

    @pl.when(e == 0)
    def _init():
        acc_ref[...] = jnp.zeros_like(acc_ref)

    def mdot(a, b):  # MXU matmul with mxu_dtype operands, f32 accumulation
        return jnp.dot(a.astype(mxu_dtype), b.astype(mxu_dtype),
                       preferred_element_type=jnp.float32)

    # One-hot scatter / gather masks built directly in the MXU dtype (0/1 is
    # exact in bf16).  Edges targeting another node tile or padding (-1)
    # match no row, so they contribute nothing.
    base = n * tn
    tgt_row = tgt_row_ref[...] - base                                    # [1, TE]
    tgt_col = tgt_col_ref[...] - base                                    # [TE, 1]
    scat = (jax.lax.broadcasted_iota(jnp.int32, (tn, te), 0)
            == tgt_row).astype(mxu_dtype)                                # [TN, TE]
    gath = (jax.lax.broadcasted_iota(jnp.int32, (te, tn), 1)
            == tgt_col).astype(mxu_dtype)                                # [TE, TN]

    # In-kernel gather of target-node features from the resident node tile.
    # Edges whose target lies outside this tile get zeros here; their
    # (garbage) messages are masked out by `scat` below.
    x_m = x_ref[...].astype(mxu_dtype)
    tgt_feats = mdot(gath, x_m)                                          # [TE, HP]

    # ---- message MLP (split matmuls, no lane concat) -------------------------
    w_m1s = w_msg_ref[0:hp, :]
    w_m1t = w_msg_ref[hp:2 * hp, :]
    w_m2 = w_msg_ref[2 * hp:3 * hp, :]
    w_m1e = w_msg_ref[3 * hp:3 * hp + edp, :]

    h = (mdot(src_ref[...], w_m1s) + mdot(tgt_feats, w_m1t)
         + mdot(ea_ref[...], w_m1e) + b_msg_ref[0:1, :])
    h = jnp.maximum(h, 0.0)          # ReLU; Dropout(0.1) is identity in eval mode
    messages = mdot(h, w_m2) + b_msg_ref[1:2, :]                         # [TE, HP]

    # ---- scatter-add (pre-transposed one-hot matmul) into the f32 accumulator
    acc_ref[...] += mdot(scat, messages)

    # ---- epilogue: gated update + LayerNorm on this node tile -----------------
    @pl.when(e == pl.num_programs(1) - 1)
    def _finalize():
        x = x_ref[...]                 # residual path stays f32
        agg = acc_ref[...]

        w_gx = w_upd_ref[0:hp, :]
        w_ga = w_upd_ref[hp:2 * hp, :]
        w_u1x = w_upd_ref[2 * hp:3 * hp, :]
        w_u1a = w_upd_ref[3 * hp:4 * hp, :]
        w_u2 = w_upd_ref[4 * hp:5 * hp, :]
        b_g = v_upd_ref[0:1, :]
        b_u1 = v_upd_ref[1:2, :]
        b_u2 = v_upd_ref[2:3, :]
        gamma = v_upd_ref[3:4, :]
        beta = v_upd_ref[4:5, :]

        gate = jax.nn.sigmoid(mdot(x, w_gx) + mdot(agg, w_ga) + b_g)
        u = jnp.maximum(mdot(x, w_u1x) + mdot(agg, w_u1a) + b_u1, 0.0)
        update = mdot(u, w_u2) + b_u2
        output = gate * update + (1.0 - gate) * x     # zero-padded lanes stay 0

        # LayerNorm over the true hidden width; centered two-pass variance with
        # a lane mask so the zero-padded lanes do not perturb the stats.
        inv_h = 1.0 / float(hidden_dim)
        lane = jax.lax.broadcasted_iota(jnp.int32, (1, hp), 1)
        lane_mask = (lane < hidden_dim).astype(jnp.float32)
        mean = jnp.sum(output, axis=-1, keepdims=True) * inv_h
        centered = (output - mean) * lane_mask
        var = jnp.sum(centered * centered, axis=-1, keepdims=True) * inv_h
        normed = centered * jax.lax.rsqrt(var + 1e-5)
        out_ref[...] = (normed * gamma + beta).astype(out_ref.dtype)


# ----------------------------------------------------------------------------
# Wrapper
# ----------------------------------------------------------------------------
def enhanced_message_layer(x, edge_index, edge_attr, params, *,
                           tile_n=256, tile_e=512, mxu_dtype=jnp.bfloat16):
    """x: [N, H] float; edge_index: [2, E] int; edge_attr: [E, Ed] float.

    `mxu_dtype` controls matmul-operand precision (bf16 recommended on v6e/v7x;
    float32 gives reference-faithful numerics).  Accumulation and the VPU
    epilogue (gate / LayerNorm) are always float32.
    """
    n_nodes, hidden = x.shape
    n_edges, edge_dim = edge_attr.shape
    assert n_nodes > 0 and n_edges > 0
    f32 = jnp.float32

    HP = _round_up(hidden, 128)                  # lane-dense hidden dim
    EDp = _round_up(edge_dim, 8)

    # ---- node tiling: keep the "parallel" axis >= 2 tiles when possible so
    # both v7x TensorCores get work (inert on single-TC v5e/v6e).
    TN = _round_up(min(tile_n, n_nodes), 8)
    if _round_up(n_nodes, TN) // TN < 2 and n_nodes > 8:
        TN = _round_up((n_nodes + 1) // 2, 8)
    NP = _round_up(n_nodes, TN)
    num_node_tiles = NP // TN

    # ---- edge tiling: lane-dense blocks plus one trailing all-padding
    # "dummy" block that out-of-range grid steps are pointed at.
    TE = min(_round_up(max(tile_e, 128), 128), _round_up(n_edges, 128))
    EP = _round_up(n_edges, TE) + TE
    num_edge_blocks = EP // TE
    dummy_blk = num_edge_blocks - 1

    # ---- sort edges by target node so each node tile touches a contiguous
    # range of edge blocks (message work now scales with E, not tiles x E).
    tgt = edge_index[1].astype(jnp.int32)
    order = jnp.argsort(tgt)
    src_idx = edge_index[0].astype(jnp.int32)[order]
    tgt_sorted = tgt[order]
    ea_sorted = jnp.asarray(edge_attr, f32)[order]

    # Per-node-tile edge-block schedule, flattened into a 1-D scalar-prefetched
    # lookup table: tbl[n*max_blk + e] = edge block to visit at grid step (n,e).
    tile_lo = jnp.arange(num_node_tiles, dtype=jnp.int32) * TN
    first = jnp.searchsorted(tgt_sorted, tile_lo, side="left")
    last = jnp.searchsorted(tgt_sorted, tile_lo + TN, side="left")
    blk_start = (first // TE).astype(jnp.int32)
    blk_cnt = jnp.where(last > first,
                        (last - 1) // TE + 1 - blk_start, 0).astype(jnp.int32)
    max_blk = max(int(jnp.max(blk_cnt)), 1)      # grid extent (wrapper runs eagerly)
    e_ids = jnp.arange(max_blk, dtype=jnp.int32)[None, :]
    blk_tbl = jnp.where(e_ids < blk_cnt[:, None], blk_start[:, None] + e_ids,
                        dummy_blk).astype(jnp.int32).reshape(-1)

    # ---- padded / packed kernel operands --------------------------------------
    def pad2(a, rows, cols, dtype):
        a = jnp.asarray(a, f32)
        return jnp.pad(a, ((0, rows - a.shape[0]),
                           (0, cols - a.shape[1]))).astype(dtype)

    x_p = pad2(x, NP, HP, f32)
    # TODO(synk): for graphs where x does not fit VMEM, gather src rows
    # in-kernel from x left in HBM (pl.ANY + manual DMA) instead of
    # materializing [E, HP] here; target features are already gathered
    # in-kernel from the resident node tile.
    src_p = pad2(jnp.take(jnp.asarray(x, f32), src_idx, axis=0), EP, HP, mxu_dtype)
    ea_p = pad2(ea_sorted, EP, EDp, mxu_dtype)
    tgt_pad = jnp.pad(tgt_sorted, (0, EP - n_edges), constant_values=-1)
    tgt_row = tgt_pad[None, :]                   # [1, EP]  lane layout
    tgt_col = tgt_pad[:, None]                   # [EP, 1]  sublane layout

    H = hidden
    w_m1 = jnp.asarray(params["w_m1"], f32)
    w_g = jnp.asarray(params["w_g"], f32)
    w_u1 = jnp.asarray(params["w_u1"], f32)
    # packed message weights: [w_m1_src | w_m1_tgt | w_m2 | w_m1_edge]
    w_msg = jnp.concatenate([
        pad2(w_m1[:H], HP, HP, f32),
        pad2(w_m1[H:2 * H], HP, HP, f32),
        pad2(params["w_m2"], HP, HP, f32),
        pad2(w_m1[2 * H:], EDp, HP, f32),
    ], axis=0).astype(mxu_dtype)
    b_msg = jnp.concatenate([pad2(params["b_m1"], 1, HP, f32),
                             pad2(params["b_m2"], 1, HP, f32)], axis=0)
    # packed update weights: [w_gate_x | w_gate_agg | w_u1_x | w_u1_agg | w_u2]
    w_upd = jnp.concatenate([
        pad2(w_g[:H], HP, HP, f32),
        pad2(w_g[H:], HP, HP, f32),
        pad2(w_u1[:H], HP, HP, f32),
        pad2(w_u1[H:], HP, HP, f32),
        pad2(params["w_u2"], HP, HP, f32),
    ], axis=0).astype(mxu_dtype)
    v_upd = jnp.concatenate([pad2(params["b_g"], 1, HP, f32),
                             pad2(params["b_u1"], 1, HP, f32),
                             pad2(params["b_u2"], 1, HP, f32),
                             pad2(params["gamma"], 1, HP, f32),
                             pad2(params["beta"], 1, HP, f32)], axis=0)

    # ---- grid / specs ----------------------------------------------------------
    def _eblk(n, e, tbl):
        return tbl[n * max_blk + e]

    grid = (num_node_tiles, max_blk)
    in_specs = [
        pl.BlockSpec((TN, HP), lambda n, e, tbl: (n, 0)),                    # x
        pl.BlockSpec((TE, HP), lambda n, e, tbl: (_eblk(n, e, tbl), 0)),     # src
        pl.BlockSpec((TE, EDp), lambda n, e, tbl: (_eblk(n, e, tbl), 0)),    # edge_attr
        pl.BlockSpec((1, TE), lambda n, e, tbl: (0, _eblk(n, e, tbl))),      # tgt (row)
        pl.BlockSpec((TE, 1), lambda n, e, tbl: (_eblk(n, e, tbl), 0)),      # tgt (col)
        # TODO(synk): at HP >= 512 single-buffer these resident weight streams
        # (pipeline_mode=pl.Buffered(1)) and/or keep them bf16 to stay inside
        # v7x's 64 MiB VMEM.
        pl.BlockSpec(w_msg.shape, lambda n, e, tbl: (0, 0)),
        pl.BlockSpec(b_msg.shape, lambda n, e, tbl: (0, 0)),
        pl.BlockSpec(w_upd.shape, lambda n, e, tbl: (0, 0)),
        pl.BlockSpec(v_upd.shape, lambda n, e, tbl: (0, 0)),
    ]

    # VMEM budget from the actual tile footprint (double-buffered inputs +
    # output + f32 accumulator); never request v7x's full 64 MiB.
    tile_bytes = 2 * (
        _nbytes((TN, HP), f32)
        + _nbytes((TE, HP), mxu_dtype)
        + _nbytes((TE, EDp), mxu_dtype)
        + _nbytes((1, TE), jnp.int32)
        + _nbytes((TE, 1), jnp.int32)
        + _nbytes(w_msg.shape, mxu_dtype)
        + _nbytes(b_msg.shape, f32)
        + _nbytes(w_upd.shape, mxu_dtype)
        + _nbytes(v_upd.shape, f32)
        + _nbytes((TN, HP), f32)
    ) + _nbytes((TN, HP), f32)
    vmem_limit = int(min(48 * 1024 * 1024, max(8 * 1024 * 1024, 2 * tile_bytes)))

    kernel = functools.partial(
        _message_layer_kernel, hidden_dim=hidden, hp=HP, edp=EDp,
        tile_n=TN, mxu_dtype=mxu_dtype)

    out = pl.pallas_call(
        kernel,
        out_shape=jax.ShapeDtypeStruct((NP, HP), f32),
        grid_spec=pltpu.PrefetchScalarGridSpec(
            num_scalar_prefetch=1,
            grid=grid,
            in_specs=in_specs,
            out_specs=pl.BlockSpec((TN, HP), lambda n, e, tbl: (n, 0)),
            scratch_shapes=[pltpu.VMEM((TN, HP), jnp.float32)],
        ),
        compiler_params=pltpu.CompilerParams(
            dimension_semantics=("parallel", "arbitrary"),
            vmem_limit_bytes=vmem_limit,
        ),
    )(blk_tbl, x_p, src_p, ea_p, tgt_row, tgt_col, w_msg, b_msg, w_upd, v_upd)

    return out[:n_nodes, :hidden].astype(x.dtype)


# ----------------------------------------------------------------------------
# Pure-JAX reference (mirrors the PyTorch forward, eval mode)
# ----------------------------------------------------------------------------
def reference(x, edge_index, edge_attr, params):
    src = x[edge_index[0]]
    tgt = x[edge_index[1]]
    msg_in = jnp.concatenate([src, tgt, edge_attr], axis=-1)
    h = jax.nn.relu(msg_in @ params["w_m1"] + params["b_m1"])
    messages = h @ params["w_m2"] + params["b_m2"]
    aggregated = jnp.zeros_like(x).at[edge_index[1]].add(messages)
    ui = jnp.concatenate([x, aggregated], axis=-1)
    gate = jax.nn.sigmoid(ui @ params["w_g"] + params["b_g"])
    u = jax.nn.relu(ui @ params["w_u1"] + params["b_u1"])
    update = u @ params["w_u2"] + params["b_u2"]
    output = gate * update + (1.0 - gate) * x
    mean = jnp.mean(output, axis=-1, keepdims=True)
    var = jnp.mean((output - mean) ** 2, axis=-1, keepdims=True)
    normed = (output - mean) * jax.lax.rsqrt(var + 1e-5)
    return normed * params["gamma"] + params["beta"]


# ----------------------------------------------------------------------------
def make_params(key, hidden_dim, edge_dim):
    ks = jax.random.split(key, 10)

    def lin(k, fan_in, fan_out):
        bound = 1.0 / (fan_in ** 0.5)
        kw, kb = jax.random.split(k)
        w = jax.random.uniform(kw, (fan_in, fan_out), jnp.float32, -bound, bound)
        b = jax.random.uniform(kb, (1, fan_out), jnp.float32, -bound, bound)
        return w, b

    w_m1, b_m1 = lin(ks[0], 2 * hidden_dim + edge_dim, hidden_dim)
    w_m2, b_m2 = lin(ks[1], hidden_dim, hidden_dim)
    w_g, b_g = lin(ks[2], 2 * hidden_dim, hidden_dim)
    w_u1, b_u1 = lin(ks[3], 2 * hidden_dim, hidden_dim)
    w_u2, b_u2 = lin(ks[4], hidden_dim, hidden_dim)
    gamma = jnp.ones((1, hidden_dim), jnp.float32)
    beta = jnp.zeros((1, hidden_dim), jnp.float32)
    return dict(w_m1=w_m1, b_m1=b_m1, w_m2=w_m2, b_m2=b_m2,
                w_g=w_g, b_g=b_g, w_u1=w_u1, b_u1=b_u1,
                w_u2=w_u2, b_u2=b_u2, gamma=gamma, beta=beta)


if __name__ == "__main__":
    hidden_dim = 32
    edge_dim = 3
    num_nodes = 48      # -> 2 node tiles of 24 ("parallel" axis, feeds both v7x TCs)
    num_edges = 200     # -> 1 real edge block of 256 + 1 dummy block

    key = jax.random.PRNGKey(0)
    k_x, k_ei, k_ea, k_p = jax.random.split(key, 4)

    x = jax.random.normal(k_x, (num_nodes, hidden_dim), jnp.float32)
    edge_index = jax.random.randint(k_ei, (2, num_edges), 0, num_nodes,
                                    dtype=jnp.int32)
    edge_attr = jax.random.normal(k_ea, (num_edges, edge_dim), jnp.float32)
    params = make_params(k_p, hidden_dim, edge_dim)

    ref = jax.block_until_ready(reference(x, edge_index, edge_attr, params))

    # f32 MXU operands: tight check against the pure-JAX / PyTorch semantics.
    out_f32 = jax.block_until_ready(
        enhanced_message_layer(x, edge_index, edge_attr, params,
                               mxu_dtype=jnp.float32))
    assert out_f32.shape == (num_nodes, hidden_dim)
    err_f32 = float(jnp.max(jnp.abs(out_f32 - ref)))
    assert err_f32 < 1e-4, f"f32 path max abs err {err_f32}"

    # bf16 MXU operands (v6e / v7x fast path): loose sanity check only — the
    # operands are deliberately rounded to bf16, accumulation stays f32.
    out_bf16 = jax.block_until_ready(
        enhanced_message_layer(x, edge_index, edge_attr, params,
                               mxu_dtype=jnp.bfloat16))
    err_bf16 = float(jnp.max(jnp.abs(out_bf16 - ref)))
    mean_bf16 = float(jnp.mean(jnp.abs(out_bf16 - ref)))
    assert err_bf16 < 2.5e-1 and mean_bf16 < 5e-2, \
        f"bf16 path errs max={err_bf16} mean={mean_bf16}"

    print("KERNEL_OK")
</pallas_src>

<mosaic_0001>
module attributes {stable_mosaic.version = 11 : i64} {
  func.func @_message_layer_kernel(%arg0: i32, %arg1: i32, %arg2: memref<2xi32, #tpu.memory_space<smem>>, %arg3: memref<24x128xf32, #tpu.memory_space<vmem>>, %arg4: memref<256x128xf32, #tpu.memory_space<vmem>>, %arg5: memref<256x8xf32, #tpu.memory_space<vmem>>, %arg6: memref<1x256xi32, #tpu.memory_space<vmem>>, %arg7: memref<256x1xi32, #tpu.memory_space<vmem>>, %arg8: memref<392x128xf32, #tpu.memory_space<vmem>>, %arg9: memref<2x128xf32, #tpu.memory_space<vmem>>, %arg10: memref<640x128xf32, #tpu.memory_space<vmem>>, %arg11: memref<5x128xf32, #tpu.memory_space<vmem>>, %arg12: memref<24x128xf32, #tpu.memory_space<vmem>>, %arg13: memref<24x128xf32, #tpu.memory_space<vmem>>) attributes {dimension_semantics = [#tpu.dimension_semantics<parallel>, #tpu.dimension_semantics<arbitrary>], iteration_bounds = array<i64: 2, 1>, scalar_prefetch = 1 : i64, scratch_operands = 1 : i64, tpu.core_type = #tpu.core_type<tc>, window_params = [{transform_indices = @transform_0, window_bounds = array<i64: 24, 128>}, {transform_indices = @transform_1, window_bounds = array<i64: 256, 128>}, {transform_indices = @transform_2, window_bounds = array<i64: 256, 8>}, {transform_indices = @transform_3, window_bounds = array<i64: 1, 256>}, {transform_indices = @transform_4, window_bounds = array<i64: 256, 1>}, {pipeline_mode = #tpu.pipeline_mode<synchronous>, transform_indices = @transform_5, window_bounds = array<i64: 392, 128>}, {pipeline_mode = #tpu.pipeline_mode<synchronous>, transform_indices = @transform_6, window_bounds = array<i64: 2, 128>}, {pipeline_mode = #tpu.pipeline_mode<synchronous>, transform_indices = @transform_7, window_bounds = array<i64: 640, 128>}, {pipeline_mode = #tpu.pipeline_mode<synchronous>, transform_indices = @transform_8, window_bounds = array<i64: 5, 128>}, {transform_indices = @transform_9, window_bounds = array<i64: 24, 128>}]} {
    %c0_i32 = arith.constant 0 : i32
    %0 = arith.cmpi eq, %arg1, %c0_i32 : i32
    %1 = arith.extui %0 : i1 to i32
    %c0_i32_0 = arith.constant 0 : i32
    %2 = arith.cmpi ne, %1, %c0_i32_0 : i32
    scf.if %2 {
      %cst_30 = arith.constant 0.000000e+00 : f32
      %49 = vector.broadcast %cst_30 : f32 to vector<24x128xf32>
      %c0_31 = arith.constant 0 : index
      %c0_32 = arith.constant 0 : index
      %50 = vector.load %arg13[%c0_31, %c0_32] : memref<24x128xf32, #tpu.memory_space<vmem>>, vector<24x128xf32>
      tpu.vector_store %arg13[%c0_31, %c0_32], %49 {strides = array<i32>} : memref<24x128xf32, #tpu.memory_space<vmem>>, vector<24x128xf32>,
    } else {
    }
    %c24_i32 = arith.constant 24 : i32
    %3 = arith.muli %arg0, %c24_i32 : i32
    %c0 = arith.constant 0 : index
    %c0_1 = arith.constant 0 : index
    %4 = vector.load %arg6[%c0, %c0_1] : memref<1x256xi32, #tpu.memory_space<vmem>>, vector<1x256xi32>
    %5 = vector.broadcast %3 : i32 to vector<1x256xi32>
    %6 = arith.subi %4, %5 : vector<1x256xi32>
    %c0_2 = arith.constant 0 : index
    %c0_3 = arith.constant 0 : index
    %7 = vector.load %arg7[%c0_2, %c0_3] : memref<256x1xi32, #tpu.memory_space<vmem>>, vector<256x1xi32>
    %8 = vector.broadcast %3 : i32 to vector<256x1xi32>
    %9 = arith.subi %7, %8 : vector<256x1xi32>
    %10 = tpu.iota {dimensions = array<i32: 0>} : vector<24x256xi32>
    %11 = vector.broadcast %6 : vector<1x256xi32> to vector<24x256xi32>
    %12 = arith.cmpi eq, %10, %11 : vector<24x256xi32>
    %13 = arith.extui %12 : vector<24x256xi1> to vector<24x256xi32>
    %14 = arith.sitofp %13 : vector<24x256xi32> to vector<24x256xf32>
    %15 = tpu.iota {dimensions = array<i32: 1>} : vector<256x24xi32>
    %16 = vector.broadcast %9 : vector<256x1xi32> to vector<256x24xi32>
    %17 = arith.cmpi eq, %15, %16 : vector<256x24xi32>
    %18 = arith.extui %17 : vector<256x24xi1> to vector<256x24xi32>
    %19 = arith.sitofp %18 : vector<256x24xi32> to vector<256x24xf32>
    %c0_4 = arith.constant 0 : index
    %c0_5 = arith.constant 0 : index
    %20 = vector.load %arg3[%c0_4, %c0_5] : memref<24x128xf32, #tpu.memory_space<vmem>>, vector<24x128xf32>
    %cst = arith.constant dense<0.000000e+00> : vector<256x128xf32>
    %21 = tpu.matmul %19, %20, %cst {dimension_numbers = #tpu.dot_dimension_numbers<[1], [0], [0], [1], [0, 0, 1, 1], [], []>} : vector<256x24xf32>, vector<24x128xf32>, vector<256x128xf32> -> vector<256x128xf32>
    %c0_6 = arith.constant 0 : index
    %c0_7 = arith.constant 0 : index
    %22 = vector.load %arg8[%c0_6, %c0_7] : memref<392x128xf32, #tpu.memory_space<vmem>>, vector<128x128xf32>
    %c128 = arith.constant 128 : index
    %c0_8 = arith.constant 0 : index
    %23 = vector.load %arg8[%c128, %c0_8] : memref<392x128xf32, #tpu.memory_space<vmem>>, vector<128x128xf32>
    %c256 = arith.constant 256 : index
    %c0_9 = arith.constant 0 : index
    %24 = vector.load %arg8[%c256, %c0_9] : memref<392x128xf32, #tpu.memory_space<vmem>>, vector<128x128xf32>
    %c384 = arith.constant 384 : index
    %c0_10 = arith.constant 0 : index
    %25 = vector.load %arg8[%c384, %c0_10] : memref<392x128xf32, #tpu.memory_space<vmem>>, vector<8x128xf32>
    %c0_11 = arith.constant 0 : index
    %c0_12 = arith.constant 0 : index
    %26 = vector.load %arg4[%c0_11, %c0_12] : memref<256x128xf32, #tpu.memory_space<vmem>>, vector<256x128xf32>
    %cst_13 = arith.constant dense<0.000000e+00> : vector<256x128xf32>
    %27 = tpu.matmul %26, %22, %cst_13 {dimension_numbers = #tpu.dot_dimension_numbers<[1], [0], [0], [1], [0, 0, 1, 1], [], []>} : vector<256x128xf32>, vector<128x128xf32>, vector<256x128xf32> -> vector<256x128xf32>
    %cst_14 = arith.constant dense<0.000000e+00> : vector<256x128xf32>
    %28 = tpu.matmul %21, %23, %cst_14 {dimension_numbers = #tpu.dot_dimension_numbers<[1], [0], [0], [1], [0, 0, 1, 1], [], []>} : vector<256x128xf32>, vector<128x128xf32>, vector<256x128xf32> -> vector<256x128xf32>
    %29 = arith.addf %27, %28 : vector<256x128xf32>
    %c0_15 = arith.constant 0 : index
    %c0_16 = arith.constant 0 : index
    %30 = vector.load %arg5[%c0_15, %c0_16] : memref<256x8xf32, #tpu.memory_space<vmem>>, vector<256x8xf32>
    %cst_17 = arith.constant dense<0.000000e+00> : vector<256x128xf32>
    %31 = tpu.matmul %30, %25, %cst_17 {dimension_numbers = #tpu.dot_dimension_numbers<[1], [0], [0], [1], [0, 0, 1, 1], [], []>} : vector<256x8xf32>, vector<8x128xf32>, vector<256x128xf32> -> vector<256x128xf32>
    %32 = arith.addf %29, %31 : vector<256x128xf32>
    %c0_18 = arith.constant 0 : index
    %c0_19 = arith.constant 0 : index
    %33 = vector.load %arg9[%c0_18, %c0_19] : memref<2x128xf32, #tpu.memory_space<vmem>>, vector<1x128xf32>
    %34 = vector.broadcast %33 : vector<1x128xf32> to vector<256x128xf32>
    %35 = arith.addf %32, %34 : vector<256x128xf32>
    %cst_20 = arith.constant 0.000000e+00 : f32
    %36 = vector.broadcast %cst_20 : f32 to vector<256x128xf32>
    %37 = arith.maximumf %35, %36 : vector<256x128xf32>
    %cst_21 = arith.constant dense<0.000000e+00> : vector<256x128xf32>
    %38 = tpu.matmul %37, %24, %cst_21 {dimension_numbers = #tpu.dot_dimension_numbers<[1], [0], [0], [1], [0, 0, 1, 1], [], []>} : vector<256x128xf32>, vector<128x128xf32>, vector<256x128xf32> -> vector<256x128xf32>
    %c1 = arith.constant 1 : index
    %c0_22 = arith.constant 0 : index
    %39 = vector.load %arg9[%c1, %c0_22] : memref<2x128xf32, #tpu.memory_space<vmem>>, vector<1x128xf32>
    %40 = vector.broadcast %39 : vector<1x128xf32> to vector<256x128xf32>
    %41 = arith.addf %38, %40 : vector<256x128xf32>
    %c0_23 = arith.constant 0 : index
    %c0_24 = arith.constant 0 : index
    %42 = vector.load %arg13[%c0_23, %c0_24] : memref<24x128xf32, #tpu.memory_space<vmem>>, vector<24x128xf32>
    %cst_25 = arith.constant dense<0.000000e+00> : vector<24x128xf32>
    %43 = tpu.matmul %14, %41, %cst_25 {dimension_numbers = #tpu.dot_dimension_numbers<[1], [0], [0], [1], [0, 0, 1, 1], [], []>} : vector<24x256xf32>, vector<256x128xf32>, vector<24x128xf32> -> vector<24x128xf32>
    %44 = arith.addf %42, %43 : vector<24x128xf32>
    %c0_26 = arith.constant 0 : index
    %c0_27 = arith.constant 0 : index
    %45 = vector.load %arg13[%c0_26, %c0_27] : memref<24x128xf32, #tpu.memory_space<vmem>>, vector<24x128xf32>
    tpu.vector_store %arg13[%c0_26, %c0_27], %44 {strides = array<i32>} : memref<24x128xf32, #tpu.memory_space<vmem>>, vector<24x128xf32>,
    %c0_i32_28 = arith.constant 0 : i32
    %46 = arith.cmpi eq, %arg1, %c0_i32_28 : i32
    %47 = arith.extui %46 : i1 to i32
    %c0_i32_29 = arith.constant 0 : i32
    %48 = arith.cmpi ne, %47, %c0_i32_29 : i32
    scf.if %48 {
      %c0_30 = arith.constant 0 : index
      %c0_31 = arith.constant 0 : index
      %49 = vector.load %arg3[%c0_30, %c0_31] : memref<24x128xf32, #tpu.memory_space<vmem>>, vector<24x128xf32>
      %c0_32 = arith.constant 0 : index
      %c0_33 = arith.constant 0 : index
      %50 = vector.load %arg13[%c0_32, %c0_33] : memref<24x128xf32, #tpu.memory_space<vmem>>, vector<24x128xf32>
      %c0_34 = arith.constant 0 : index
      %c0_35 = arith.constant 0 : index
      %51 = vector.load %arg10[%c0_34, %c0_35] : memref<640x128xf32, #tpu.memory_space<vmem>>, vector<128x128xf32>
      %c128_36 = arith.constant 128 : index
      %c0_37 = arith.constant 0 : index
      %52 = vector.load %arg10[%c128_36, %c0_37] : memref<640x128xf32, #tpu.memory_space<vmem>>, vector<128x128xf32>
      %c256_38 = arith.constant 256 : index
      %c0_39 = arith.constant 0 : index
      %53 = vector.load %arg10[%c256_38, %c0_39] : memref<640x128xf32, #tpu.memory_space<vmem>>, vector<128x128xf32>
      %c384_40 = arith.constant 384 : index
      %c0_41 = arith.constant 0 : index
      %54 = vector.load %arg10[%c384_40, %c0_41] : memref<640x128xf32, #tpu.memory_space<vmem>>, vector<128x128xf32>
      %c512 = arith.constant 512 : index
      %c0_42 = arith.constant 0 : index
      %55 = vector.load %arg10[%c512, %c0_42] : memref<640x128xf32, #tpu.memory_space<vmem>>, vector<128x128xf32>
      %c0_43 = arith.constant 0 : index
      %c0_44 = arith.constant 0 : index
      %56 = vector.load %arg11[%c0_43, %c0_44] : memref<5x128xf32, #tpu.memory_space<vmem>>, vector<1x128xf32>
      %c1_45 = arith.constant 1 : index
      %c0_46 = arith.constant 0 : index
      %57 = vector.load %arg11[%c1_45, %c0_46] : memref<5x128xf32, #tpu.memory_space<vmem>>, vector<1x128xf32>
      %c2 = arith.constant 2 : index
      %c0_47 = arith.constant 0 : index
      %58 = vector.load %arg11[%c2, %c0_47] : memref<5x128xf32, #tpu.memory_space<vmem>>, vector<1x128xf32>
      %c3 = arith.constant 3 : index
      %c0_48 = arith.constant 0 : index
      %59 = vector.load %arg11[%c3, %c0_48] : memref<5x128xf32, #tpu.memory_space<vmem>>, vector<1x128xf32>
      %c4 = arith.constant 4 : index
      %c0_49 = arith.constant 0 : index
      %60 = vector.load %arg11[%c4, %c0_49] : memref<5x128xf32, #tpu.memory_space<vmem>>, vector<1x128xf32>
      %cst_50 = arith.constant dense<0.000000e+00> : vector<24x128xf32>
      %61 = tpu.matmul %49, %51, %cst_50 {dimension_numbers = #tpu.dot_dimension_numbers<[1], [0], [0], [1], [0, 0, 1, 1], [], []>} : vector<24x128xf32>, vector<128x128xf32>, vector<24x128xf32> -> vector<24x128xf32>
      %cst_51 = arith.constant dense<0.000000e+00> : vector<24x128xf32>
      %62 = tpu.matmul %50, %52, %cst_51 {dimension_numbers = #tpu.dot_dimension_numbers<[1], [0], [0], [1], [0, 0, 1, 1], [], []>} : vector<24x128xf32>, vector<128x128xf32>, vector<24x128xf32> -> vector<24x128xf32>
      %63 = arith.addf %61, %62 : vector<24x128xf32>
      %64 = vector.broadcast %56 : vector<1x128xf32> to vector<24x128xf32>
      %65 = arith.addf %63, %64 : vector<24x128xf32>
      %66 = arith.negf %65 : vector<24x128xf32>
      %67 = math.exp %66 : vector<24x128xf32>
      %cst_52 = arith.constant 1.000000e+00 : f32
      %68 = vector.broadcast %cst_52 : f32 to vector<24x128xf32>
      %69 = arith.addf %68, %67 : vector<24x128xf32>
      %70 = arith.divf %68, %69 : vector<24x128xf32>
      %cst_53 = arith.constant dense<0.000000e+00> : vector<24x128xf32>
      %71 = tpu.matmul %49, %53, %cst_53 {dimension_numbers = #tpu.dot_dimension_numbers<[1], [0], [0], [1], [0, 0, 1, 1], [], []>} : vector<24x128xf32>, vector<128x128xf32>, vector<24x128xf32> -> vector<24x128xf32>
      %cst_54 = arith.constant dense<0.000000e+00> : vector<24x128xf32>
      %72 = tpu.matmul %50, %54, %cst_54 {dimension_numbers = #tpu.dot_dimension_numbers<[1], [0], [0], [1], [0, 0, 1, 1], [], []>} : vector<24x128xf32>, vector<128x128xf32>, vector<24x128xf32> -> vector<24x128xf32>
      %73 = arith.addf %71, %72 : vector<24x128xf32>
      %74 = vector.broadcast %57 : vector<1x128xf32> to vector<24x128xf32>
      %75 = arith.addf %73, %74 : vector<24x128xf32>
      %cst_55 = arith.constant 0.000000e+00 : f32
      %76 = vector.broadcast %cst_55 : f32 to vector<24x128xf32>
      %77 = arith.maximumf %75, %76 : vector<24x128xf32>
      %cst_56 = arith.constant dense<0.000000e+00> : vector<24x128xf32>
      %78 = tpu.matmul %77, %55, %cst_56 {dimension_numbers = #tpu.dot_dimension_numbers<[1], [0], [0], [1], [0, 0, 1, 1], [], []>} : vector<24x128xf32>, vector<128x128xf32>, vector<24x128xf32> -> vector<24x128xf32>
      %79 = vector.broadcast %58 : vector<1x128xf32> to vector<24x128xf32>
      %80 = arith.addf %78, %79 : vector<24x128xf32>
      %81 = arith.mulf %70, %80 : vector<24x128xf32>
      %cst_57 = arith.constant 1.000000e+00 : f32
      %82 = vector.broadcast %cst_57 : f32 to vector<24x128xf32>
      %83 = arith.subf %82, %70 : vector<24x128xf32>
      %84 = arith.mulf %83, %49 : vector<24x128xf32>
      %85 = arith.addf %81, %84 : vector<24x128xf32>
      %86 = tpu.iota {dimensions = array<i32: 1>} : vector<1x128xi32>
      %c32_i32 = arith.constant 32 : i32
      %87 = vector.broadcast %c32_i32 : i32 to vector<1x128xi32>
      %88 = arith.cmpi slt, %86, %87 : vector<1x128xi32>
      %89 = arith.extui %88 : vector<1x128xi1> to vector<1x128xi32>
      %90 = arith.sitofp %89 : vector<1x128xi32> to vector<1x128xf32>
      %cst_58 = arith.constant dense<0.000000e+00> : vector<24xf32>
      %91 = vector.multi_reduction <add>, %85, %cst_58 [1] : vector<24x128xf32> to vector<24xf32>
      %92 = vector.shape_cast %91 : vector<24xf32> to vector<24x1xf32>
      %cst_59 = arith.constant 3.125000e-02 : f32
      %93 = vector.broadcast %cst_59 : f32 to vector<24x1xf32>
      %94 = arith.mulf %92, %93 : vector<24x1xf32>
      %95 = vector.broadcast %94 : vector<24x1xf32> to vector<24x128xf32>
      %96 = arith.subf %85, %95 : vector<24x128xf32>
      %97 = vector.broadcast %90 : vector<1x128xf32> to vector<24x128xf32>
      %98 = arith.mulf %96, %97 : vector<24x128xf32>
      %99 = arith.mulf %98, %98 : vector<24x128xf32>
      %cst_60 = arith.constant dense<0.000000e+00> : vector<24xf32>
      %100 = vector.multi_reduction <add>, %99, %cst_60 [1] : vector<24x128xf32> to vector<24xf32>
      %101 = vector.shape_cast %100 : vector<24xf32> to vector<24x1xf32>
      %cst_61 = arith.constant 3.125000e-02 : f32
      %102 = vector.broadcast %cst_61 : f32 to vector<24x1xf32>
      %103 = arith.mulf %101, %102 : vector<24x1xf32>
      %cst_62 = arith.constant 9.99999974E-6 : f32
      %104 = vector.broadcast %cst_62 : f32 to vector<24x1xf32>
      %105 = arith.addf %103, %104 : vector<24x1xf32>
      %106 = math.rsqrt %105 : vector<24x1xf32>
      %107 = vector.broadcast %106 : vector<24x1xf32> to vector<24x128xf32>
      %108 = arith.mulf %98, %107 : vector<24x128xf32>
      %109 = vector.broadcast %59 : vector<1x128xf32> to vector<24x128xf32>
      %110 = arith.mulf %108, %109 : vector<24x128xf32>
      %111 = vector.broadcast %60 : vector<1x128xf32> to vector<24x128xf32>
      %112 = arith.addf %110, %111 : vector<24x128xf32>
      %c0_63 = arith.constant 0 : index
      %c0_64 = arith.constant 0 : index
      %113 = vector.load %arg12[%c0_63, %c0_64] : memref<24x128xf32, #tpu.memory_space<vmem>>, vector<24x128xf32>
      tpu.vector_store %arg12[%c0_63, %c0_64], %112 {strides = array<i32>} : memref<24x128xf32, #tpu.memory_space<vmem>>, vector<24x128xf32>,
    } else {
    }
    return
  }
  func.func @transform_0(%arg0: i32, %arg1: i32, %arg2: memref<2xi32, #tpu.memory_space<smem>>) -> (i32, i32) {
    %c0_i32 = arith.constant 0 : i32
    %c0_i32_0 = arith.constant 0 : i32
    return %arg0, %c0_i32 : i32, i32
  }
  func.func @transform_1(%arg0: i32, %arg1: i32, %arg2: memref<2xi32, #tpu.memory_space<smem>>) -> (i32, i32) {
    %c1_i32 = arith.constant 1 : i32
    %0 = arith.muli %arg0, %c1_i32 : i32
    %1 = arith.addi %0, %arg1 : i32
    %2 = arith.index_cast %1 : i32 to index
    %3 = memref.load %arg2[%2] : memref<2xi32, #tpu.memory_space<smem>>
    %c0_i32 = arith.constant 0 : i32
    %c0_i32_0 = arith.constant 0 : i32
    return %3, %c0_i32 : i32, i32
  }
  func.func @transform_2(%arg0: i32, %arg1: i32, %arg2: memref<2xi32, #tpu.memory_space<smem>>) -> (i32, i32) {
    %c1_i32 = arith.constant 1 : i32
    %0 = arith.muli %arg0, %c1_i32 : i32
    %1 = arith.addi %0, %arg1 : i32
    %2 = arith.index_cast %1 : i32 to index
    %3 = memref.load %arg2[%2] : memref<2xi32, #tpu.memory_space<smem>>
    %c0_i32 = arith.constant 0 : i32
    %c0_i32_0 = arith.constant 0 : i32
    return %3, %c0_i32 : i32, i32
  }
  func.func @transform_3(%arg0: i32, %arg1: i32, %arg2: memref<2xi32, #tpu.memory_space<smem>>) -> (i32, i32) {
    %c1_i32 = arith.constant 1 : i32
    %0 = arith.muli %arg0, %c1_i32 : i32
    %1 = arith.addi %0, %arg1 : i32
    %2 = arith.index_cast %1 : i32 to index
    %3 = memref.load %arg2[%2] : memref<2xi32, #tpu.memory_space<smem>>
    %c0_i32 = arith.constant 0 : i32
    %c0_i32_0 = arith.constant 0 : i32
    return %c0_i32, %3 : i32, i32
  }
  func.func @transform_4(%arg0: i32, %arg1: i32, %arg2: memref<2xi32, #tpu.memory_space<smem>>) -> (i32, i32) {
    %c1_i32 = arith.constant 1 : i32
    %0 = arith.muli %arg0, %c1_i32 : i32
    %1 = arith.addi %0, %arg1 : i32
    %2 = arith.index_cast %1 : i32 to index
    %3 = memref.load %arg2[%2] : memref<2xi32, #tpu.memory_space<smem>>
    %c0_i32 = arith.constant 0 : i32
    %c0_i32_0 = arith.constant 0 : i32
    return %3, %c0_i32 : i32, i32
  }
  func.func @transform_5(%arg0: i32, %arg1: i32, %arg2: memref<2xi32, #tpu.memory_space<smem>>) -> (i32, i32) {
    %c0_i32 = arith.constant 0 : i32
    %c0_i32_0 = arith.constant 0 : i32
    %c0_i32_1 = arith.constant 0 : i32
    return %c0_i32, %c0_i32_0 : i32, i32
  }
  func.func @transform_6(%arg0: i32, %arg1: i32, %arg2: memref<2xi32, #tpu.memory_space<smem>>) -> (i32, i32) {
    %c0_i32 = arith.constant 0 : i32
    %c0_i32_0 = arith.constant 0 : i32
    %c0_i32_1 = arith.constant 0 : i32
    return %c0_i32, %c0_i32_0 : i32, i32
  }
  func.func @transform_7(%arg0: i32, %arg1: i32, %arg2: memref<2xi32, #tpu.memory_space<smem>>) -> (i32, i32) {
    %c0_i32 = arith.constant 0 : i32
    %c0_i32_0 = arith.constant 0 : i32
    %c0_i32_1 = arith.constant 0 : i32
    return %c0_i32, %c0_i32_0 : i32, i32
  }
  func.func @transform_8(%arg0: i32, %arg1: i32, %arg2: memref<2xi32, #tpu.memory_space<smem>>) -> (i32, i32) {
    %c0_i32 = arith.constant 0 : i32
    %c0_i32_0 = arith.constant 0 : i32
    %c0_i32_1 = arith.constant 0 : i32
    return %c0_i32, %c0_i32_0 : i32, i32
  }
  func.func @transform_9(%arg0: i32, %arg1: i32, %arg2: memref<2xi32, #tpu.memory_space<smem>>) -> (i32, i32) {
    %c0_i32 = arith.constant 0 : i32
    %c0_i32_0 = arith.constant 0 : i32
    return %arg0, %c0_i32 : i32, i32
  }
}

</mosaic_0001>

<bundles_post_ra>
// kernel: tpu_custom_call.1
= control target key start
LH: loop header
LB: loop body
LE: loop exit
PB: predicated region body
PF: predicated region fallthrough
CT: control target
= control target key end

     0   :  { %s6236_s0 = inlined_call_operand.hbm [shape: s32[2], index: 0, kind: input, shape index: {}]   ;;  %s6237_s1 = inlined_call_operand.vmem [shape: f32[48,128], index: 1, kind: input, shape index: {}]   ;;  %s6238_s2 = inlined_call_operand.hbm [shape: f32[512,128], index: 2, kind: input, shape index: {}]   ;;  %s6239_s3 = inlined_call_operand.vmem [shape: f32[512,8], index: 3, kind: input, shape index: {}]   ;;  %s6240_s4 = inlined_call_operand.hbm [shape: s32[1,512], index: 4, kind: input, shape index: {}]   ;;  %s6241_s5 = inlined_call_operand.vmem [shape: s32[512,1], index: 5, kind: input, shape index: {}]   ;;  %s6242_s6 = inlined_call_operand.vmem [shape: f32[392,128], index: 6, kind: input, shape index: {}]   ;;  %s6243_s7 = inlined_call_operand.vmem [shape: f32[2,128], index: 7, kind: input, shape index: {}]   ;;  %s6244_s8 = inlined_call_operand.vmem [shape: f32[640,128], index: 8, kind: input, shape index: {}]   ;;  %s6245_s9 = inlined_call_operand.vmem [shape: f32[5,128], index: 9, kind: input, shape index: {}]   ;;  %s6246_s10 = inlined_call_operand.hbm [shape: f32[48,128], index: 10, kind: output, shape index: {}]  }
   0x1   :  { %6259 = sst [smem:[#allocation23_spill]] %s6237_s1  ;;  %s4713_s15 = scalar_lea.hbm %s6236_s0, 16 }
   0x2   :  { %6260 = sst [smem:[#allocation24_spill]] %s6238_s2  ;;  %p4714_p0 = scmp.ne.s32.totalorder %s6236_s0, %s4713_s15 }
   0x3   :  { %6261 = sst [smem:[#allocation25_spill]] %s6239_s3  ;;  %p4717_p1 = scmp.lt.u32.totalorder %s4713_s15, %s6236_s0 }
   0x4   :  { %6262 = sst [smem:[#allocation26_spill]] %s6242_s6 }
   0x5   :  { %6263 = sst [smem:[#allocation27_spill]] %s6243_s7  ;;  %p4719_p2 = pnand %p4717_p1, %p4714_p0 }
   0x6   :  { %6264 = sst [smem:[#allocation28_spill]] %s6244_s8 }
   0x7   :  { %6265 = sst [smem:[#allocation29_spill]] %s6245_s9 }
   0x8   :  { %6266 = sst [smem:[#allocation30_spill]] %s6246_s10 }
   0x9   :  { %4722 = shalt.err (!%p4719_p2)  }
   0xa   :  { %s4921_s20 = smov [#allocation4]  }
   0xb   :  { %16 = dma.hbm_to_smem %s6236_s0, 16, %s4921_s20, [#allocation3] }
   0xc   :  { %4859 = dma.done.wait [#allocation3], 16 }
   0xd   :  { %4860 = vsyncadd [#allocation3], 4294967280 }
   0xe   :  { %18 = sfence }
   0xf   :  { %19 = vsyncpa [#allocation6], 0 }
  0x10   :  { %21 = vsyncpa [#allocation6 + $0x1], 0 }
  0x11   :  { %22 = vsyncpa [#allocation9], 0 }
  0x12   :  { %24 = vsyncpa [#allocation9 + $0x1], 0 }
  0x13   :  { %25 = vsyncpa [#allocation7], 0 }
  0x14   :  { %27 = vsyncpa [#allocation7 + $0x1], 0  ;;  %s5001_s23 = smov 0   ;;  %s5003_s24 = smov 0  }
  0x15   :  { %s5005_s25 = smov 0   ;;  %s5007_s26 = smov 0  }
  0x16   :  { %s5009_s27 = smov 0   ;;  %s5011_s0 = smov 0  }
  0x17   :  { %s5013_s28 = smov 0   ;;  %s5015_s29 = smov 0  }
  0x18   :  { %s5017_s30 = smov 0   ;;  %s5019_s11 = smov 0  }
  0x19   :  { %s5021_s12 = smov 0   ;;  %s5023_s13 = smov 0  }
  0x1a LB: > { %6267 = sst [smem:[#allocation19_spill]] %s4907_s30  ;;  %s45_s14 = sadd.s32 1, %s4915_s12  ;;  %s4919_s13 = sphi %s5023_s13, %s33_s13   ;;  %s4915_s12 = sphi %s5021_s12, %s6302_s12   ;;  %s4911_s11 = sphi %s5019_s11, %s6301_s11   ;;  %s4907_s30 = sphi %s5017_s30, %s6300_s30   ;;  %s4903_s29 = sphi %s5015_s29, %s6310_s29   ;;  %s4899_s28 = sphi %s5013_s28, %s6309_s28   ;;  %s4895_s0 = sphi %s5011_s0, %s6308_s0   ;;  %s4891_s27 = sphi %s5009_s27, %s6307_s27   ;;  %s4887_s26 = sphi %s5007_s26, %s6306_s26   ;;  %s4883_s25 = sphi %s5005_s25, %s6305_s25   ;;  %s4879_s24 = sphi %s5003_s24, %s6304_s24   ;;  %s4875_s23 = sphi %s5001_s23, %s6303_s23  }
  0x1b   : > { %6268 = sst [smem:[#allocation20_spill]] %s4915_s12  ;;  %p47_p3 = scmp.ge.s32.totalorder %s45_s14, 2 }
  0x1c   : > { %s76_s15 = sld [smem:[#allocation4 + %s4915_s12]]  ;;  %s82_s16 = sadd.s32 1, %s4907_s30 }
  0x1d   : > { %p89_p4 = scmp.ne.s32.totalorder %s4907_s30, %s4903_s29  ;;  %p6253_p5 = scmp.eq.s32.totalorder %s4919_s13, 0 }
  0x1e   : > { %s6312_s14 = smov (%p47_p3, %s45_s14), 0  ;;  %p6252_p10 = scmp.lt.s32.totalorder %s4919_s13, 2 }
  0x1f   : > { %6269 = sst [smem:[#allocation21_spill]] %s6312_s14  ;;  %p5071_p6 = por %p6253_p5, %p89_p4 }
  0x20   : > { %s78_s18 = sld [smem:[#allocation4 + %s6312_s14]]  ;;  %s279_s19 = ssub.s32 %s4915_s12, %s6312_s14 }
  0x21   : > { %p5080_p8 = scmp.eq.s32.totalorder %s279_s19, 0  ;;  %s340_s21 = sand.u32 1, %s4907_s30  }
  0x22   : > { %s3207_s22 = sshll.u32 %s340_s21, 8  ;;  %p5091_p11 = pnand %p6252_p10, %p5071_p6 }
  0x23   : > { %s4560_s9 = scalar_select %p5071_p6, [#allocation4], [#allocation11] }
  0x24   : > { %s344_s7 = scalar_lea.vmem [#allocation5], %s3207_s22  ;;  %p3213_p13 = scmp.ge.s32.totalorder %s4919_s13, 1 }
  0x25   : > { %s353_s19 = sshll.u32 %s344_s7, 4  ;;  %s6314_s9 = smov (!%p6252_p10, %s4560_s9), [#allocation13]  ;;  %s5097_s19 = int_to_ptr.vmem [resolvable:$true] %s353_s19 }
  0x26   : > { %s79_s8 = ssub.s32 %s76_s15, %s78_s18  ;;  %p408_p0 = scmp.lt.s32.totalorder %s4919_s13, 3 }
  0x27   : > { %p80_p12 = scmp.eq.s32.totalorder %s79_s8, 0  ;;  %s6275_s2 = sld [smem:[#allocation24_spill]] }
  0x28   : > { %s4561_s3 = scalar_select %p5071_p6, %s4915_s12, 0 }
  0x29   : > { %s5103_s6 = scalar_select %p80_p12, %s4907_s30, %s82_s16  }
  0x2a   : > { %s6316_s3 = smov (!%p6252_p10, %s4561_s3), 0  ;;  %p5111_p1 = pnand %p3213_p13, %p408_p0 }
  0x2b   : > { %6273 = sst [smem:[#allocation22_spill]] %s5103_s6  ;;  %s5120_s16 = scalar_lea.sflag [#allocation6], %s340_s21 }
  0x2c   : > { %s346_s1 = sld [smem:[%s6314_s9 + %s6316_s3]]  ;;  %p4725_p3 = pneg %p5091_p11 }
  0x2d   : > { %s6274_s15 = scalar_select %p5111_p1, 1, 0 }
  0x2e   : > { %s4728_s9 = scalar_lea.hbm %s6275_s2, 8192 }
  0x32   : > { %s3343_s7 = sshll.u32 %s346_s1, 12 }
  0x33   : > { %s5118_s22 = scalar_lea.hbm %s6275_s2, %s3343_s7 }
  0x34   : > { %s4723_s17 = scalar_lea.hbm %s5118_s22, 4096  ;;  %p4729_p12 = scmp.lt.u32.totalorder %s5118_s22, %s6275_s2 }
  0x35   : > { %p4724_p2 = scmp.ne.s32.totalorder %s5118_s22, %s4723_s17  ;;  %p4730_p13 = scmp.lt.u32.totalorder %s4728_s9, %s4723_s17 }
  0x36   : > { %p4732_p9 = scmp.lt.u32.totalorder %s4723_s17, %s5118_s22 }
  0x37   : > { %p4726_p4 = pnand %p4725_p3, %p4724_p2  ;;  %p4731_p0 = por %p4730_p13, %p4729_p12 }
  0x39   : > { %p4727_p6 = pneg %p4726_p4  ;;  %p4733_p10 = por %p4732_p9, %p4731_p0 }
  0x3b   : > { %p4734_p5 = pnand %p4733_p10, %p4727_p6 }
  0x3d   : > { %4737 = shalt.err (!%p4734_p5)
}
  0x3e   : > { %s4738_s21 = scalar_lea.vmem %s5097_s19, 4096  ;;  %s4922_s18 = smov [#allocation5]  }
  0x3f   : > { %p4739_p2 = scmp.ne.s32.totalorder %s5097_s19, %s4738_s21  ;;  %s4743_s1 = sshll.u32 %s4922_s18, 4  ;;  %s4744_s1 = int_to_ptr.vmem [resolvable:$false] %s4743_s1 }
  0x40   : > { %s4745_s3 = scalar_lea.vmem %s4744_s1, 8192  ;;  %p4746_p1 = scmp.lt.s32.totalorder %s5097_s19, %s4744_s1 }
  0x41   : > { %p4741_p4 = pnand %p4739_p2, %p4725_p3  ;;  %p4747_p12 = scmp.lt.s32.totalorder %s4745_s3, %s4738_s21 }
  0x43   : > { %p4742_p7 = pneg %p4741_p4  ;;  %p4748_p13 = por %p4747_p12, %p4746_p1 }
  0x45   : > { %p4749_p9 = pnand %p4748_p13, %p4742_p7 }
  0x47   : > { %4752 = shalt.err (!%p4749_p9)
}
  0x48   : > { %s4923_s17 = smov 128   ;;  %s4924_s9 = smov 8  }
  0x49   : > { %4575 = dma.hbm_to_vmem [thread:$0]  (!%p5091_p11), %s5118_s22, 4096, %s5097_s19, %s5120_s16, %s4923_s17, %s4923_s17, %s4924_s9  }
  0x4a   : > { %s3203_s7 = sadd.s32 4294967295, %s4919_s13   ;;  %s3204_s8 = sadd.s32 4294967294, %s4919_s13  }
  0x4b   : > { %p96_p5 = scmp.eq.s32.totalorder %s3203_s7, 0  ;;  %s136_s21 = sld [smem:[#allocation4 + %s4915_s12]] }
  0x4c   : > { %s138_s18 = sld [smem:[#allocation4 + %s6312_s14]]  ;;  %p6276_p7 = scmp.ne.s32.totalorder %s4903_s29, %s4899_s28 }
  0x4d   : > { %s142_s3 = sadd.s32 1, %s4895_s0  ;;  %p149_p1 = scmp.ne.s32.totalorder %s4895_s0, %s4891_s27 }
  0x4e   : > { %p5155_p10 = por %p96_p5, %p6276_p7  ;;  %p155_p3 = scmp.ne.s32.totalorder %s4891_s27, %s4887_s26 }
  0x4f   : > { %s282_s10 = sadd.s32 1, %s4883_s25  ;;  %p292_p11 = scmp.ne.s32.totalorder %s4883_s25, %s4879_s24 }
  0x50   : > { %p6278_p6 = scmp.eq.s32.totalorder %s4919_s13, 0  ;;  %p5173_p2 = por %p155_p3, %p96_p5 }
  0x51   : > { %s5180_s26 = scalar_select %p5080_p8, %s4883_s25, %s282_s10  }
  0x52   : > { %p5169_p0 = por %p149_p1, %p6278_p6  ;;  %s139_s22 = ssub.s32 %s136_s21, %s138_s18 }
  0x53   : > { %s6280_s28 = scalar_select %p5173_p2, 1, 0 }
  0x54   : > { %p293_p4 = scmp.eq.s32.totalorder %s3203_s7, 1  ;;  %p140_p12 = scmp.eq.s32.totalorder %s139_s22, 0 }
  0x55   : > { %p298_p13 = scmp.ne.s32.totalorder %s4879_s24, %s4875_s23  ;;  %p299_p7 = scmp.eq.s32.totalorder %s3204_s8, 1 }
  0x56   : > { %p5184_p9 = por %p293_p4, %p292_p11  ;;  %s376_s2 = sand.u32 1, %s4895_s0  }
  0x57   : > { %s5189_s17 = scalar_select %p140_p12, %s4895_s0, %s142_s3  }
  0x58   : > { %s6281_s16 = scalar_select %p5184_p9, 1, 0 }
  0x59   : > { %p5191_p1 = por %p299_p7, %p298_p13  ;;  %s3210_s20 = sshll.u32 %s376_s2, 1 }
  0x5a   : > { %p6283_p8 = scmp.lt.s32.totalorder %s4919_s13, 2  ;;  %s380_s3 = scalar_lea.vmem [#allocation8], %s3210_s20 }
  0x5b   : > { %s6282_s9 = scalar_select %p5191_p1, 1, 0 }
  0x5c   : > { %p5200_p5 = pnand %p6283_p8, %p5169_p0  ;;  %p6285_p3 = pmov %p6283_p8 }
  0x5d   : > { %s4563_s7 = scalar_select %p5169_p0, [#allocation4], [#allocation12] }
  0x5e   : > { %s4564_s8 = scalar_select %p5169_p0, %s4915_s12, 0 }
  0x5f   : > { %s6318_s7 = smov (!%p6285_p3, %s4563_s7), [#allocation14]  ;;  %p6286_p11 = pmov %p6285_p3 }
  0x60   : > { %s390_s10 = sshll.u32 %s380_s3, 4  ;;  %s377_s19 = scalar_lea.sflag [#allocation9], %s376_s2  ;;  %s5213_s10 = int_to_ptr.vmem [resolvable:$true] %s390_s10 }
  0x61   : > { %s6320_s8 = smov (!%p6286_p11, %s4564_s8), 0  ;;  %p4755_p0 = pneg %p5200_p5 }
  0x62   : > { %s382_s18 = sld [smem:[%s6318_s7 + %s6320_s8]]  ;;  %s4758_s8 = scalar_lea.hbm %s6240_s4, 64 }
  0x68   : > { %s3344_s22 = sshll.u32 %s382_s18, 5 }
  0x69   : > { %s5218_s30 = scalar_lea.hbm %s6240_s4, %s3344_s22 }
  0x6a   : > { %s4753_s12 = scalar_lea.hbm %s5218_s30, 32  ;;  %p4759_p13 = scmp.lt.u32.totalorder %s5218_s30, %s6240_s4 }
  0x6b   : > { %p4754_p6 = scmp.ne.s32.totalorder %s5218_s30, %s4753_s12  ;;  %p4760_p7 = scmp.lt.u32.totalorder %s4758_s8, %s4753_s12 }
  0x6c   : > { %p4762_p3 = scmp.lt.u32.totalorder %s4753_s12, %s5218_s30 }
  0x6d   : > { %p4756_p4 = pnand %p4755_p0, %p4754_p6  ;;  %p4761_p8 = por %p4760_p7, %p4759_p13 }
  0x6f   : > { %p4757_p12 = pneg %p4756_p4  ;;  %p4763_p11 = por %p4762_p3, %p4761_p8 }
  0x71   : > { %p4764_p1 = pnand %p4763_p11, %p4757_p12 }
  0x73   : > { %4767 = shalt.err (!%p4764_p1)
}
  0x74   : > { %s4768_s2 = scalar_lea.vmem %s5213_s10, 32  ;;  %s4925_s18 = smov [#allocation8]  }
  0x75   : > { %p4769_p6 = scmp.ne.s32.totalorder %s5213_s10, %s4768_s2  ;;  %s4773_s3 = sshll.u32 %s4925_s18, 4  ;;  %s4774_s3 = int_to_ptr.vmem [resolvable:$false] %s4773_s3 }
  0x76   : > { %s4775_s22 = scalar_lea.vmem %s4774_s3, 64  ;;  %p4776_p2 = scmp.lt.s32.totalorder %s5213_s10, %s4774_s3 }
  0x77   : > { %p4771_p4 = pnand %p4769_p6, %p4755_p0  ;;  %p4777_p13 = scmp.lt.s32.totalorder %s4775_s22, %s4768_s2 }
  0x79   : > { %p4772_p9 = pneg %p4771_p4  ;;  %p4778_p7 = por %p4777_p13, %p4776_p2 }
  0x7b   : > { %p4779_p8 = pnand %p4778_p7, %p4772_p9 }
  0x7d   : > { %4782 = shalt.err (!%p4779_p8)
}
  0x7e   : > { %4580 = dma.hbm_to_vmem [thread:$0]  (!%p5200_p5), %s5218_s30, 32, %s5213_s10, %s377_s19  }
  0x7f   : > { %p6287_p1 = scmp.ne.s32.totalorder %s6274_s15, 0 }
  0x80   : > { %s414_s12 = sand.u32 (!%p6287_p1), 1, %s4903_s29  }
  0x81   : > { %412 = sbr.rel (%p6287_p1) target bundleno = 2182 (0x886), region = 56  ;;  %s3214_s20 = sshll.u32 (!%p6287_p1), %s414_s12, 8 }
  0x82   : > { %s415_s7 = scalar_lea.sflag (!%p6287_p1), [#allocation6], %s414_s12  ;;  %s5248_s8 = scalar_lea.vmem (!%p6287_p1), [#allocation5], %s3214_s20 }
  0x88   : > { %4862 = dma.done.wait (%p5155_p10), %s415_s7, 4096  }
  0x89   : > { %4864 = vsyncadd (%p5155_p10), %s415_s7, 4294963200  ;;  %s423_s21 = sand.u32 1, %s4891_s27   ;;  %p6288_p2 = scmp.ne.s32.totalorder %s6280_s28, 0 }
  0x8a   : > { %s5255_s6 = sshll.u32 %s423_s21, 1  ;;  %s424_s30 = scalar_lea.sflag [#allocation9], %s423_s21 }
  0x8b   : > { %s427_s15 = scalar_lea.vmem [#allocation8], %s5255_s6 }
  0x8c   : > { %4866 = dma.done.wait (%p6288_p2), %s424_s30, 32  }
  0x8d   : > { %4868 = vsyncadd (%p6288_p2), %s424_s30, 4294967264  ;;  %v4926_v0 = vmov 0   ;;  %s509_s1 = sld [smem:[#allocation4 + %s4911_s11]]  ;;  %s486_s10 = smul.u32 3, %s4911_s11  ;;  %vm821_vm0 = vcmask 195584  }
  0x8e   : > { %4694 = vset.pattern.permute.xlu1 %v4926_v0  ;;  %4693 = vset.pattern.permute.xlu0 %v4926_v0  ;;  %s526_s14 = smul.u32 24, %s4911_s11  ;;  %s6289_s7 = sld [smem:[#allocation23_spill]] }
  0x8f   : > { %p487_p9 = scmp.lt.s32.totalorder %s486_s10, 5  ;;  %s496_s20 = sld [smem:[#allocation4 + %s4911_s11]] }
  0x90   : > { %v5265_v1 = vstv %s526_s14  ;;  %s6291_s14 = sld [smem:[#allocation25_spill]]  ;;  %s483_s3 = sand.u32 1, %s4879_s24  }
  0x91   : > { %s6324_s10 = smov (!%p487_p9, %s486_s10), 5  ;;  %p6296_p12 = scmp.ne.s32.totalorder %s6281_s16, 0 }
  0x92   : > { %s3216_s22 = sshll.u32 %s6324_s10, 3  ;;  %s6290_s10 = sld [smem:[#allocation26_spill]] }
  0x93   : > { %s3219_s19 = sshll.u32 %s509_s1, 5  ;;  %s6293_s1 = sld [smem:[#allocation28_spill]] }
  0x94   : > { %p511_p10 = scmp.lt.s32.totalorder %s3219_s19, 63  ;;  %s5287_s21 = scalar_lea.vmem %s6289_s7, %s3216_s22 }
  0x95   : > { %v818_v16 = vld [vmem:[%s5287_s21] sm:$0xff]  ;;  %v819_v19 = vld [vmem:[%s5287_s21 + $0x8] sm:$0xff]  ;;  %v820_v23 = vld [vmem:[%s5287_s21 + $0x10] sm:$0xff]  ;;  %s3217_s7 = sshll.u32 %s496_s20, 5  ;;  %s6292_s20 = sld [smem:[#allocation27_spill]] }
  0x96   : > { %s6322_s19 = smov (!%p511_p10, %s3219_s19), 63  ;;  %v4243_v22 = vpack.c.bf16 %v819_v19, %v818_v16  ;;  %p498_p5 = scmp.lt.s32.totalorder %s3217_s7, 63 }
  0x97   : > { %s3220_s2 = sshll.u32 %s6322_s19, 3  ;;  %s6294_s19 = sld [smem:[#allocation29_spill]] }
  0x98   : > { %s5270_s28 = scalar_lea.vmem %s6241_s5, %s3220_s2  ;;  %4244 = vmatprep.subr.bf16.mxu0 %v4243_v22  ;;  %v1165_v16 = vld [vmem:[%s6290_s10 + $0xb0] sm:$0xff]  ;;  %v1167_v19 = vld [vmem:[%s6290_s10 + $0xc0] sm:$0xff]  ;;  %s6326_s7 = smov (!%p498_p5, %s3217_s7), 63 }
  0x99   : > { %v532_v2 = vld [vmem:[%s5270_s28 + $0x10] sm:$0xff]  ;;  %v530_v3 = vld [vmem:[%s5270_s28] sm:$0xff]  ;;  %v533_v4 = vld [vmem:[%s5270_s28 + $0x18] sm:$0xff]  ;;  %4246 = vmatpush3.bf16.msra.mxu0 %v4243_v22  ;;  %s3218_s30 = sshll.u32 %s6326_s7, 3  ;;  %s4559_s22 = smul.u32 24, %s483_s3 }
  0x9a   : > { %v564_v5 = vsub.s32 %v532_v2, %v5265_v1  ;;  %v562_v6 = vsub.s32 %v530_v3, %v5265_v1  ;;  %v531_v7 = vld [vmem:[%s5270_s28 + $0x8] sm:$0xff]  ;;  %v565_v8 = vsub.s32 %v533_v4, %v5265_v1  ;;  %v534_v11 = vld [vmem:[%s5270_s28 + $0x20] sm:$0xff]  ;;  %v537_v14 = vld [vmem:[%s5270_s28 + $0x38] sm:$0xff]  ;;  %3698 = vmatprep.subr.mxu0 %v820_v23  ;;  %s5619_s2 = scalar_lea.vmem %s6291_s14, %s3218_s30  ;;  %s3345_s7 = smul.u32 384, %s4911_s11 }
  0x9b   : > { %v563_v9 = vsub.s32 %v531_v7, %v5265_v1  ;;  %v535_v10 = vld [vmem:[%s5270_s28 + $0x28] sm:$0xff]  ;;  %v566_v13 = vsub.s32 %v534_v11, %v5265_v1  ;;  %v536_v15 = vld [vmem:[%s5270_s28 + $0x30] sm:$0xff]  ;;  %v569_v17 = vsub.s32 %v537_v14, %v5265_v1  ;;  %v538_v21 = vld [vmem:[%s5270_s28 + $0x40] sm:$0xff] }
  0x9c   : > { %633 = vperm.xlu1 %4694, %v564_v5   ;;  %627 = vperm.xlu0 %4693, %v562_v6   ;;  %v567_v12 = vsub.s32 %v535_v10, %v5265_v1  ;;  %v568_v18 = vsub.s32 %v536_v15, %v5265_v1  ;;  %v539_v20 = vld [vmem:[%s5270_s28 + $0x48] sm:$0xff]  ;;  %v570_v25 = vsub.s32 %v538_v21, %v5265_v1  ;;  %v541_v26 = vld [vmem:[%s5270_s28 + $0x58] sm:$0xff]  ;;  %v540_v27 = vld [vmem:[%s5270_s28 + $0x50] sm:$0xff] }
  0x9d   : > { %v571_v24 = vsub.s32 %v539_v20, %v5265_v1  ;;  %v573_v28 = vsub.s32 %v541_v26, %v5265_v1  ;;  %v572_v29 = vsub.s32 %v540_v27, %v5265_v1  ;;  %v543_v30 = vld [vmem:[%s5270_s28 + $0x68] sm:$0xff]  ;;  %v542_v31 = vld [vmem:[%s5270_s28 + $0x60] sm:$0xff]  ;;  %3699 = vmatpush3.msra.mxu0 %v820_v23  ;;  %v545_v34 = vld [vmem:[%s5270_s28 + $0x78] sm:$0xff] }
  0x9e   : > { %v575_v32 = vsub.s32 %v543_v30, %v5265_v1  ;;  %v574_v33 = vsub.s32 %v542_v31, %v5265_v1  ;;  %v544_v35 = vld [vmem:[%s5270_s28 + $0x70] sm:$0xff]  ;;  %v577_v36 = vsub.s32 %v545_v34, %v5265_v1  ;;  %v547_v38 = vld [vmem:[%s5270_s28 + $0x88] sm:$0xff]  ;;  %v546_v39 = vld [vmem:[%s5270_s28 + $0x80] sm:$0xff]  ;;  %v594_v31 = vlaneseq }
  0x9f   : > { %v576_v37 = vsub.s32 %v544_v35, %v5265_v1  ;;  %v579_v40 = vsub.s32 %v547_v38, %v5265_v1  ;;  %v578_v41 = vsub.s32 %v546_v39, %v5265_v1  ;;  %v549_v42 = vld [vmem:[%s5270_s28 + $0x98] sm:$0xff]  ;;  %v548_v43 = vld [vmem:[%s5270_s28 + $0x90] sm:$0xff]  ;;  %v551_v46 = vld [vmem:[%s5270_s28 + $0xa8] sm:$0xff]  ;;  %v4927_v35 = vmov 0.0  }
  0xa0   : > { %636 = vperm.xlu1 %4694, %v565_v8   ;;  %630 = vperm.xlu0 %4693, %v563_v9   ;;  %v581_v44 = vsub.s32 %v549_v42, %v5265_v1  ;;  %v580_v45 = vsub.s32 %v548_v43, %v5265_v1  ;;  %v550_v47 = vld [vmem:[%s5270_s28 + $0xa0] sm:$0xff]  ;;  %v583_v48 = vsub.s32 %v551_v46, %v5265_v1  ;;  %v553_v50 = vld [vmem:[%s5270_s28 + $0xb8] sm:$0xff]  ;;  %v552_v51 = vld [vmem:[%s5270_s28 + $0xb0] sm:$0xff] }
  0xa1   : > { %v582_v49 = vsub.s32 %v550_v47, %v5265_v1  ;;  %v585_v52 = vsub.s32 %v553_v50, %v5265_v1  ;;  %v584_v53 = vsub.s32 %v552_v51, %v5265_v1  ;;  %v555_v54 = vld [vmem:[%s5270_s28 + $0xc8] sm:$0xff]  ;;  %v554_v55 = vld [vmem:[%s5270_s28 + $0xc0] sm:$0xff]  ;;  %v557_v58 = vld [vmem:[%s5270_s28 + $0xd8] sm:$0xff] }
  0xa2   : > { %v587_v56 = vsub.s32 %v555_v54, %v5265_v1  ;;  %v586_v57 = vsub.s32 %v554_v55, %v5265_v1  ;;  %v556_v59 = vld [vmem:[%s5270_s28 + $0xd0] sm:$0xff]  ;;  %v589_v60 = vsub.s32 %v557_v58, %v5265_v1  ;;  %v559_v62 = vld [vmem:[%s5270_s28 + $0xe8] sm:$0xff]  ;;  %v558_v63 = vld [vmem:[%s5270_s28 + $0xe0] sm:$0xff] }
  0xa3   : > { %v588_v61 = vsub.s32 %v556_v59, %v5265_v1  ;;  %v591_v0 = vsub.s32 %v559_v62, %v5265_v1  ;;  %v590_v2 = vsub.s32 %v558_v63, %v5265_v1  ;;  %v561_v3 = vld [vmem:[%s5270_s28 + $0xf8] sm:$0xff]  ;;  %v560_v4 = vld [vmem:[%s5270_s28 + $0xf0] sm:$0xff]  ;;  %v1159_v7 = vld [vmem:[%s6290_s10 + $0x80] sm:$0xff]  ;;  %s4931_s28 = smov [#allocation10]  }
  0xa4   : > { %642 = vperm.xlu1 %4694, %v567_v12   ;;  %639 = vperm.xlu0 %4693, %v566_v13   ;;  %v593_v5 = vsub.s32 %v561_v3, %v5265_v1  ;;  %v592_v6 = vsub.s32 %v560_v4, %v5265_v1  ;;  %v1160_v8 = vld [vmem:[%s6290_s10 + $0x88] sm:$0xff]  ;;  %v1161_v9 = vld [vmem:[%s6290_s10 + $0x90] sm:$0xff]  ;;  %v1162_v11 = vld [vmem:[%s6290_s10 + $0x98] sm:$0xff] }
  0xa5   : > { %v4247_v10 = vpack.c.bf16 %v1160_v8, %v1159_v7  ;;  %v4251_v12 = vpack.c.bf16 %v1162_v11, %v1161_v9  ;;  %v1163_v13 = vld [vmem:[%s6290_s10 + $0xa0] sm:$0xff]  ;;  %v1164_v14 = vld [vmem:[%s6290_s10 + $0xa8] sm:$0xff]  ;;  %v1169_v22 = vld [vmem:[%s6290_s10 + $0xd0] sm:$0xff] }
  0xa6   : > { %v4255_v15 = vpack.c.bf16 %v1164_v14, %v1163_v13  ;;  %v1168_v20 = vld [vmem:[%s6290_s10 + $0xc8] sm:$0xff]  ;;  %v1170_v23 = vld [vmem:[%s6290_s10 + $0xd8] sm:$0xff] }
  0xa7   : > { %4248 = vmatprep.subr.bf16.mxu1 %v4247_v10  ;;  %v4263_v21 = vpack.c.bf16 %v1168_v20, %v1167_v19  ;;  %v1172_v26 = vld [vmem:[%s6290_s10 + $0xe8] sm:$0xff] }
  0xa8   : > { %648 = vperm.xlu1 %4694, %v569_v17   ;;  %645 = vperm.xlu0 %4693, %v568_v18   ;;  %v1166_v17 = vld [vmem:[%s6290_s10 + $0xb8] sm:$0xff] }
  0xa9   : > { %4250 = vmatpush3.bf16.msra.mxu1 %v4247_v10  ;;  %v4259_v18 = vpack.c.bf16 %v1166_v17, %v1165_v16 }
  0xaa   : > { %4252 = vmatprep.subr.bf16.mxu1 %v4251_v12 }
  0xac   : > { %654 = vperm.xlu1 %4694, %v571_v24   ;;  %651 = vperm.xlu0 %4693, %v570_v25   ;;  %v4267_v24 = vpack.c.bf16 %v1170_v23, %v1169_v22  ;;  %v1171_v25 = vld [vmem:[%s6290_s10 + $0xe0] sm:$0xff] }
  0xad   : > { %4254 = vmatpush3.bf16.msra.mxu1 %v4251_v12  ;;  %v4271_v27 = vpack.c.bf16 %v1172_v26, %v1171_v25 }
  0xae   : > { %4256 = vmatprep.subr.bf16.mxu1 %v4255_v15 }
  0xb0   : > { %660 = vperm.xlu1 %4694, %v573_v28   ;;  %657 = vperm.xlu0 %4693, %v572_v29   ;;  %v1173_v28 = vld [vmem:[%s6290_s10 + $0xf0] sm:$0xff]  ;;  %v1174_v29 = vld [vmem:[%s6290_s10 + $0xf8] sm:$0xff] }
  0xb1   : > { %4258 = vmatpush3.bf16.msra.mxu1 %v4255_v15  ;;  %v4275_v30 = vpack.c.bf16 %v1174_v29, %v1173_v28 }
  0xb2   : > { %4260 = vmatprep.subr.bf16.mxu1 %v4259_v18 }
  0xb4   : > { %666 = vperm.xlu1 %4694, %v575_v32   ;;  %663 = vperm.xlu0 %4693, %v574_v33   ;;  %v5393_v32 = vand.u32 127, %v594_v31 }
  0xb5   : > { %4262 = vmatpush3.bf16.msra.mxu1 %v4259_v18 }
  0xb6   : > { %4264 = vmatprep.subr.bf16.mxu1 %v4263_v21 }
  0xb8   : > { %672 = vperm.xlu1 %4694, %v577_v36   ;;  %669 = vperm.xlu0 %4693, %v576_v37  }
  0xb9   : > { %4266 = vmatpush3.bf16.msra.mxu1 %v4263_v21 }
  0xba   : > { %4268 = vmatprep.subr.bf16.mxu1 %v4267_v24 }
  0xbc   : > { %678 = vperm.xlu1 %4694, %v579_v40   ;;  %675 = vperm.xlu0 %4693, %v578_v41  }
  0xbd   : > { %4270 = vmatpush3.bf16.msra.mxu1 %v4267_v24 }
  0xbe   : > { %4272 = vmatprep.subr.bf16.mxu1 %v4271_v27 }
  0xc0   : > { %684 = vperm.xlu1 %4694, %v581_v44   ;;  %681 = vperm.xlu0 %4693, %v580_v45  }
  0xc1   : > { %4274 = vmatpush3.bf16.msra.mxu1 %v4271_v27 }
  0xc2   : > { %4276 = vmatprep.subr.bf16.mxu1 %v4275_v30 }
  0xc4   : > { %690 = vperm.xlu1 %4694, %v583_v48   ;;  %687 = vperm.xlu0 %4693, %v582_v49  }
  0xc5   : > { %4278 = vmatpush3.bf16.msra.mxu1 %v4275_v30 }
  0xc8   : > { %696 = vperm.xlu1 %4694, %v585_v52   ;;  %693 = vperm.xlu0 %4693, %v584_v53  }
  0xcc   : > { %702 = vperm.xlu1 %4694, %v587_v56   ;;  %699 = vperm.xlu0 %4693, %v586_v57  }
  0xd0   : > { %708 = vperm.xlu1 %4694, %v589_v60   ;;  %705 = vperm.xlu0 %4693, %v588_v61  }
  0xd4   : > { %714 = vperm.xlu1 %4694, %v591_v0   ;;  %711 = vperm.xlu0 %4693, %v590_v2  }
  0xd8   : > { %720 = vperm.xlu1 %4694, %v593_v5   ;;  %717 = vperm.xlu0 %4693, %v592_v6  }
 0x11b   : > { %v634_v33 = vpop.permute.xlu1 %633  ;;  %v628_v34 = vpop.permute.xlu0 %627 }
 0x11c   : > { %vm722_vm1 = vcmp.eq.s32.totalorder %v5393_v32, %v628_v34  ;;  %vm724_vm2 = vcmp.eq.s32.totalorder %v5393_v32, %v634_v33 }
 0x11d   : > { %v3227_v36 = vsel %vm722_vm1, 1.0, %v4927_v35  ;;  %v3229_v39 = vsel %vm724_vm2, 1.0, %v4927_v35 }
 0x11e   : > { %3700 = vmatprep.mubr.msk.f32.mxu0 %vm821_vm0, %v3227_v36 }
 0x11f   : > { %v637_v37 = vpop.permute.xlu1 %636  ;;  %v631_v38 = vpop.permute.xlu0 %630 }
 0x120   : > { %vm723_vm3 = vcmp.eq.s32.totalorder %v5393_v32, %v631_v38  ;;  %vm725_vm4 = vcmp.eq.s32.totalorder %v5393_v32, %v637_v37  ;;  %v1143_v38 = vld [vmem:[%s6290_s10] sm:$0xff] }
 0x121   : > { %v3228_v40 = vsel %vm723_vm3, 1.0, %v4927_v35  ;;  %v3230_v43 = vsel %vm725_vm4, 1.0, %v4927_v35 }
 0x122   : > { %3701 = vmatmul.mubr.msk.f32.vlgmr.msra.gmra.mrb[0].mxu0 %vm821_vm0, %v3228_v40 }
 0x123   : > { %v643_v41 = vpop.permute.xlu1 %642  ;;  %3703 = vmatprep.mubr.msk.f32.mxu0 %vm821_vm0, %v3229_v39  ;;  %v640_v42 = vpop.permute.xlu0 %639  ;;  %v1144_v39 = vld [vmem:[%s6290_s10 + $0x8] sm:$0xff] }
 0x124   : > { %vm726_vm5 = vcmp.eq.s32.totalorder %v5393_v32, %v640_v42  ;;  %vm727_vm6 = vcmp.eq.s32.totalorder %v5393_v32, %v643_v41  ;;  %v4279_v40 = vpack.c.bf16 %v1144_v39, %v1143_v38  ;;  %v1145_v41 = vld [vmem:[%s6290_s10 + $0x10] sm:$0xff]  ;;  %v1146_v42 = vld [vmem:[%s6290_s10 + $0x18] sm:$0xff]  ;;  %v1193_v39 = vld [vmem:[%s5248_s8 + $0x8] sm:$0xff] }
 0x125   : > { %v3231_v44 = vsel %vm726_vm5, 1.0, %v4927_v35  ;;  %v3232_v47 = vsel %vm727_vm6, 1.0, %v4927_v35  ;;  %v1177_v38 = vld [vmem:[%s6290_s10 + $0x110] sm:$0xff] }
 0x126   : > { %3704 = vmatmul.mubr.msk.f32.gmra.mrb[2].mxu0 %vm821_vm0, %v3230_v43  ;;  %4280 = vmatprep.subr.bf16.mxu1 %v4279_v40 }
 0x127   : > { %v649_v45 = vpop.permute.xlu1 %648  ;;  %3706 = vmatprep.mubr.msk.f32.mxu0 %vm821_vm0, %v3231_v44  ;;  %v646_v46 = vpop.permute.xlu0 %645 }
 0x128   : > { %vm728_vm7 = vcmp.eq.s32.totalorder %v5393_v32, %v646_v46  ;;  %vm729_vm8 = vcmp.eq.s32.totalorder %v5393_v32, %v649_v45  ;;  %v4283_v45 = vpack.c.bf16 %v1146_v42, %v1145_v41  ;;  %v1147_v46 = vld [vmem:[%s6290_s10 + $0x20] sm:$0xff]  ;;  %v1178_v41 = vld [vmem:[%s6290_s10 + $0x118] sm:$0xff]  ;;  %v1194_v42 = vld [vmem:[%s5248_s8 + $0x10] sm:$0xff] }
 0x129   : > { %v3233_v48 = vsel %vm728_vm7, 1.0, %v4927_v35  ;;  %v3234_v51 = vsel %vm729_vm8, 1.0, %v4927_v35 }
 0x12a   : > { %3707 = vmatmul.mubr.msk.f32.gmra.mrb[4].mxu0 %vm821_vm0, %v3232_v47  ;;  %v1148_v47 = vld [vmem:[%s6290_s10 + $0x28] sm:$0xff] }
 0x12b   : > { %v655_v49 = vpop.permute.xlu1 %654  ;;  %3709 = vmatprep.mubr.msk.f32.mxu0 %vm821_vm0, %v3233_v48  ;;  %v652_v50 = vpop.permute.xlu0 %651 }
 0x12c   : > { %vm730_vm9 = vcmp.eq.s32.totalorder %v5393_v32, %v652_v50  ;;  %vm731_vm10 = vcmp.eq.s32.totalorder %v5393_v32, %v655_v49  ;;  %v4287_v50 = vpack.c.bf16 %v1148_v47, %v1147_v46  ;;  %v1195_v46 = vld [vmem:[%s5248_s8 + $0x18] sm:$0xff] }
 0x12d   : > { %v3235_v52 = vsel %vm730_vm9, 1.0, %v4927_v35  ;;  %v3236_v55 = vsel %vm731_vm10, 1.0, %v4927_v35 }
 0x12e   : > { %3710 = vmatmul.mubr.msk.f32.gmra.mrb[6].mxu0 %vm821_vm0, %v3234_v51  ;;  %v1149_v51 = vld [vmem:[%s6290_s10 + $0x30] sm:$0xff] }
 0x12f   : > { %v661_v53 = vpop.permute.xlu1 %660  ;;  %3712 = vmatprep.mubr.msk.f32.mxu0 %vm821_vm0, %v3235_v52  ;;  %v658_v54 = vpop.permute.xlu0 %657  ;;  %v1150_v52 = vld [vmem:[%s6290_s10 + $0x38] sm:$0xff] }
 0x130   : > { %vm732_vm11 = vcmp.eq.s32.totalorder %v5393_v32, %v658_v54  ;;  %vm733_vm12 = vcmp.eq.s32.totalorder %v5393_v32, %v661_v53 }
 0x131   : > { %v3237_v56 = vsel %vm732_vm11, 1.0, %v4927_v35  ;;  %v3238_v59 = vsel %vm733_vm12, 1.0, %v4927_v35 }
 0x132   : > { %3713 = vmatmul.mubr.msk.f32.gmra.mrb[8].mxu0 %vm821_vm0, %v3236_v55  ;;  %v4291_v55 = vpack.c.bf16 %v1150_v52, %v1149_v51  ;;  %v1197_v51 = vld [vmem:[%s5248_s8 + $0x28] sm:$0xff] }
 0x133   : > { %v667_v57 = vpop.permute.xlu1 %666  ;;  %3715 = vmatprep.mubr.msk.f32.mxu0 %vm821_vm0, %v3237_v56  ;;  %v664_v58 = vpop.permute.xlu0 %663  ;;  %v1151_v56 = vld [vmem:[%s6290_s10 + $0x40] sm:$0xff] }
 0x134   : > { %vm734_vm13 = vcmp.eq.s32.totalorder %v5393_v32, %v664_v58  ;;  %vm735_vm14 = vcmp.eq.s32.totalorder %v5393_v32, %v667_v57  ;;  %v1152_v57 = vld [vmem:[%s6290_s10 + $0x48] sm:$0xff] }
 0x135   : > { %v3239_v60 = vsel %vm734_vm13, 1.0, %v4927_v35  ;;  %v3240_v63 = vsel %vm735_vm14, 1.0, %v4927_v35 }
 0x136   : > { %3716 = vmatmul.mubr.msk.f32.gmra.mrb[10].mxu0 %vm821_vm0, %v3238_v59 }
 0x137   : > { %v673_v61 = vpop.permute.xlu1 %672  ;;  %3718 = vmatprep.mubr.msk.f32.mxu0 %vm821_vm0, %v3239_v60  ;;  %v670_v62 = vpop.permute.xlu0 %669  ;;  %v4295_v60 = vpack.c.bf16 %v1152_v57, %v1151_v56  ;;  %v1199_v56 = vld [vmem:[%s5248_s8 + $0x38] sm:$0xff] }
 0x138   : > { %vm736_vm15 = vcmp.eq.s32.totalorder %v5393_v32, %v670_v62  ;;  %vm737_vm1 = vcmp.eq.s32.totalorder %v5393_v32, %v673_v61  ;;  %v1153_v61 = vld [vmem:[%s6290_s10 + $0x50] sm:$0xff]  ;;  %v1154_v62 = vld [vmem:[%s6290_s10 + $0x58] sm:$0xff] }
 0x139   : > { %v3241_v0 = vsel %vm736_vm15, 1.0, %v4927_v35  ;;  %v3242_v4 = vsel %vm737_vm1, 1.0, %v4927_v35 }
 0x13a   : > { %3719 = vmatmul.mubr.msk.f32.gmra.mrb[12].mxu0 %vm821_vm0, %v3240_v63 }
 0x13b   : > { %v679_v2 = vpop.permute.xlu1 %678  ;;  %3721 = vmatprep.mubr.msk.f32.mxu0 %vm821_vm0, %v3241_v0  ;;  %v676_v3 = vpop.permute.xlu0 %675 }
 0x13c   : > { %vm738_vm2 = vcmp.eq.s32.totalorder %v5393_v32, %v676_v3  ;;  %vm739_vm3 = vcmp.eq.s32.totalorder %v5393_v32, %v679_v2  ;;  %v4299_v2 = vpack.c.bf16 %v1154_v62, %v1153_v61  ;;  %v1155_v3 = vld [vmem:[%s6290_s10 + $0x60] sm:$0xff]  ;;  %v1201_v61 = vld [vmem:[%s5248_s8 + $0x48] sm:$0xff] }
 0x13d   : > { %v3243_v5 = vsel %vm738_vm2, 1.0, %v4927_v35  ;;  %v3244_v8 = vsel %vm739_vm3, 1.0, %v4927_v35 }
 0x13e   : > { %3722 = vmatmul.mubr.msk.f32.gmra.mrb[14].mxu0 %vm821_vm0, %v3242_v4  ;;  %v1156_v4 = vld [vmem:[%s6290_s10 + $0x68] sm:$0xff] }
 0x13f   : > { %v685_v6 = vpop.permute.xlu1 %684  ;;  %3724 = vmatprep.mubr.msk.f32.mxu0 %vm821_vm0, %v3243_v5  ;;  %v682_v7 = vpop.permute.xlu0 %681 }
 0x140   : > { %vm740_vm4 = vcmp.eq.s32.totalorder %v5393_v32, %v682_v7  ;;  %vm741_vm5 = vcmp.eq.s32.totalorder %v5393_v32, %v685_v6  ;;  %v4303_v7 = vpack.c.bf16 %v1156_v4, %v1155_v3  ;;  %v1203_v3 = vld [vmem:[%s5248_s8 + $0x58] sm:$0xff] }
 0x141   : > { %v3245_v9 = vsel %vm740_vm4, 1.0, %v4927_v35  ;;  %v3246_v12 = vsel %vm741_vm5, 1.0, %v4927_v35 }
 0x142   : > { %3725 = vmatmul.mubr.msk.f32.gmra.mrb[16].mxu0 %vm821_vm0, %v3244_v8  ;;  %v1157_v8 = vld [vmem:[%s6290_s10 + $0x70] sm:$0xff] }
 0x143   : > { %v691_v10 = vpop.permute.xlu1 %690  ;;  %3727 = vmatprep.mubr.msk.f32.mxu0 %vm821_vm0, %v3245_v9  ;;  %v688_v11 = vpop.permute.xlu0 %687  ;;  %v1158_v9 = vld [vmem:[%s6290_s10 + $0x78] sm:$0xff] }
 0x144   : > { %vm742_vm6 = vcmp.eq.s32.totalorder %v5393_v32, %v688_v11  ;;  %vm743_vm7 = vcmp.eq.s32.totalorder %v5393_v32, %v691_v10 }
 0x145   : > { %v3247_v13 = vsel %vm742_vm6, 1.0, %v4927_v35  ;;  %v3248_v16 = vsel %vm743_vm7, 1.0, %v4927_v35 }
 0x146   : > { %3728 = vmatmul.mubr.msk.f32.gmra.mrb[18].mxu0 %vm821_vm0, %v3246_v12  ;;  %v4307_v12 = vpack.c.bf16 %v1158_v9, %v1157_v8  ;;  %v1207_v8 = vld [vmem:[%s5248_s8 + $0x78] sm:$0xff]  ;;  %v1208_v9 = vld [vmem:[%s5248_s8 + $0x80] sm:$0xff] }
 0x147   : > { %v697_v14 = vpop.permute.xlu1 %696  ;;  %3730 = vmatprep.mubr.msk.f32.mxu0 %vm821_vm0, %v3247_v13  ;;  %v694_v15 = vpop.permute.xlu0 %693 }
 0x148   : > { %vm744_vm8 = vcmp.eq.s32.totalorder %v5393_v32, %v694_v15  ;;  %vm745_vm9 = vcmp.eq.s32.totalorder %v5393_v32, %v697_v14  ;;  %v1191_v15 = vld [vmem:[%s6290_s10 + $0x180] sm:$0xff] }
 0x149   : > { %v3249_v17 = vsel %vm744_vm8, 1.0, %v4927_v35  ;;  %v3250_v20 = vsel %vm745_vm9, 1.0, %v4927_v35  ;;  %vm4930_vm9 = vmmov 0  }
 0x14a   : > { %3731 = vmatmul.mubr.msk.f32.gmra.mrb[20].mxu0 %vm821_vm0, %v3248_v16 }
 0x14b   : > { %v703_v18 = vpop.permute.xlu1 %702  ;;  %3733 = vmatprep.mubr.msk.f32.mxu0 %vm821_vm0, %v3249_v17  ;;  %v700_v19 = vpop.permute.xlu0 %699 }
 0x14c   : > { %vm746_vm10 = vcmp.eq.s32.totalorder %v5393_v32, %v700_v19  ;;  %vm747_vm11 = vcmp.eq.s32.totalorder %v5393_v32, %v703_v18 }
 0x14d   : > { %v3251_v21 = vsel %vm746_vm10, 1.0, %v4927_v35  ;;  %v3252_v24 = vsel %vm747_vm11, 1.0, %v4927_v35  ;;  %vm2993_vm10 = vcmp.lt.s32.totalorder %v5393_v32, 32 }
 0x14e   : > { %3734 = vmatmul.mubr.msk.f32.gmra.mrb[22].mxu0 %vm821_vm0, %v3250_v20 }
 0x14f   : > { %v709_v22 = vpop.permute.xlu1 %708  ;;  %3736 = vmatprep.mubr.msk.f32.mxu0 %vm821_vm0, %v3251_v21  ;;  %v706_v23 = vpop.permute.xlu0 %705 }
 0x150   : > { %vm748_vm12 = vcmp.eq.s32.totalorder %v5393_v32, %v706_v23  ;;  %vm749_vm13 = vcmp.eq.s32.totalorder %v5393_v32, %v709_v22 }
 0x151   : > { %v3253_v25 = vsel %vm748_vm12, 1.0, %v4927_v35  ;;  %v3254_v28 = vsel %vm749_vm13, 1.0, %v4927_v35 }
 0x152   : > { %3737 = vmatmul.mubr.msk.f32.gmra.mrb[24].mxu0 %vm821_vm0, %v3252_v24 }
 0x153   : > { %v715_v26 = vpop.permute.xlu1 %714  ;;  %3739 = vmatprep.mubr.msk.f32.mxu0 %vm821_vm0, %v3253_v25  ;;  %v712_v27 = vpop.permute.xlu0 %711 }
 0x154   : > { %vm750_vm14 = vcmp.eq.s32.totalorder %v5393_v32, %v712_v27  ;;  %vm751_vm15 = vcmp.eq.s32.totalorder %v5393_v32, %v715_v26 }
 0x155   : > { %v3255_v29 = vsel %vm750_vm14, 1.0, %v4927_v35  ;;  %v3256_v34 = vsel %vm751_vm15, 1.0, %v4927_v35 }
 0x156   : > { %3740 = vmatmul.mubr.msk.f32.gmra.mrb[26].mxu0 %vm821_vm0, %v3254_v28 }
 0x157   : > { %v721_v30 = vpop.permute.xlu1 %720  ;;  %3742 = vmatprep.mubr.msk.f32.mxu0 %vm821_vm0, %v3255_v29  ;;  %v718_v33 = vpop.permute.xlu0 %717 }
 0x158   : > { %vm752_vm1 = vcmp.eq.s32.totalorder %v5393_v32, %v718_v33  ;;  %vm753_vm2 = vcmp.eq.s32.totalorder %v5393_v32, %v721_v30 }
 0x159   : > { %v3257_v36 = vsel %vm752_vm1, 1.0, %v4927_v35  ;;  %v3258_v37 = vsel %vm753_vm2, 1.0, %v4927_v35 }
 0x15a   : > { %3743 = vmatmul.mubr.msk.f32.gmra.mrb[28].mxu0 %vm821_vm0, %v3256_v34  ;;  %v1192_v34 = vld [vmem:[%s5248_s8] sm:$0xff] }
 0x15b   : > { %3745 = vmatprep.mubr.msk.f32.mxu0 %vm821_vm0, %v3257_v36  ;;  %v1175_v36 = vld [vmem:[%s6290_s10 + $0x100] sm:$0xff] }
 0x15e   : > { %3746 = vmatmul.mubr.msk.f32.gmra.mrb[30].mxu0 %vm821_vm0, %v3258_v37  ;;  %v1176_v37 = vld [vmem:[%s6290_s10 + $0x108] sm:$0xff]  ;;  %vm1706_vm0 = vcmask 64512  }
 0x1f5   : > { %v3702_v43 = vpop.f32.mrb[0].mxu0 }
 0x1f6   : > { %v984_v44 = vpop.f32.mrb[1].mxu0 }
 0x1f7   : > { %3780 = vmatprep.mubr.f32.mxu1 %v984_v44  ;;  %v1179_v44 = vld [vmem:[%s6290_s10 + $0x120] sm:$0xff] }
 0x1f8   : > { %3781 = vmatmul.mubr.f32.vlgmr.msra.gmra.mrb[0].mxu1 %v3702_v43  ;;  %v4315_v43 = vpack.c.bf16 %v1178_v41, %v1177_v38  ;;  %v1684_v38 = vld [vmem:[%s5619_s2 + $0x50] sm:$0xff]  ;;  %v1687_v41 = vld [vmem:[%s5619_s2 + $0x68] sm:$0xff] }
 0x1f9   : > { %v3705_v48 = vpop.f32.mrb[2].mxu0  ;;  %4282 = vmatpush3.bf16.msra.mxu1 %v4279_v40  ;;  %v4311_v40 = vpack.c.bf16 %v1176_v37, %v1175_v36  ;;  %v1682_v36 = vld [vmem:[%s5619_s2 + $0x40] sm:$0xff]  ;;  %v1683_v37 = vld [vmem:[%s5619_s2 + $0x48] sm:$0xff] }
 0x1fa   : > { %v994_v49 = vpop.f32.mrb[3].mxu0  ;;  %4284 = vmatprep.subr.bf16.mxu1 %v4283_v45 }
 0x1fb   : > { %3783 = vmatprep.mubr.f32.mxu1 %v994_v49  ;;  %4312 = vmatprep.subr.bf16.mxu0 %v4311_v40  ;;  %v1181_v49 = vld [vmem:[%s6290_s10 + $0x130] sm:$0xff] }
 0x1fc   : > { %3784 = vmatmul.mubr.f32.gmra.mrb[2].mxu1 %v3705_v48  ;;  %4314 = vmatpush3.bf16.msra.mxu0 %v4311_v40  ;;  %v1196_v48 = vld [vmem:[%s5248_s8 + $0x20] sm:$0xff] }
 0x1fd   : > { %v3708_v53 = vpop.f32.mrb[4].mxu0  ;;  %4286 = vmatpush3.bf16.msra.mxu1 %v4283_v45  ;;  %v1180_v45 = vld [vmem:[%s6290_s10 + $0x128] sm:$0xff]  ;;  %4316 = vmatprep.subr.bf16.mxu0 %v4315_v43  ;;  %v1686_v40 = vld [vmem:[%s5619_s2 + $0x60] sm:$0xff] }
 0x1fe   : > { %v1004_v54 = vpop.f32.mrb[5].mxu0  ;;  %4288 = vmatprep.subr.bf16.mxu1 %v4287_v50  ;;  %v4319_v47 = vpack.c.bf16 %v1180_v45, %v1179_v44  ;;  %v1690_v44 = vld [vmem:[%s5619_s2 + $0x80] sm:$0xff]  ;;  %v1691_v45 = vld [vmem:[%s5619_s2 + $0x88] sm:$0xff] }
 0x1ff   : > { %3786 = vmatprep.mubr.f32.mxu1 %v1004_v54  ;;  %v1183_v54 = vld [vmem:[%s6290_s10 + $0x140] sm:$0xff] }
 0x200   : > { %3787 = vmatmul.mubr.f32.gmra.mrb[4].mxu1 %v3708_v53  ;;  %4318 = vmatpush3.bf16.msra.mxu0 %v4315_v43  ;;  %v1198_v53 = vld [vmem:[%s5248_s8 + $0x30] sm:$0xff]  ;;  %v1689_v43 = vld [vmem:[%s5619_s2 + $0x78] sm:$0xff] }
 0x201   : > { %v3711_v58 = vpop.f32.mrb[6].mxu0  ;;  %4290 = vmatpush3.bf16.msra.mxu1 %v4287_v50  ;;  %v1182_v50 = vld [vmem:[%s6290_s10 + $0x138] sm:$0xff]  ;;  %4320 = vmatprep.subr.bf16.mxu0 %v4319_v47 }
 0x202   : > { %v1014_v59 = vpop.f32.mrb[7].mxu0  ;;  %4292 = vmatprep.subr.bf16.mxu1 %v4291_v55  ;;  %v4323_v52 = vpack.c.bf16 %v1182_v50, %v1181_v49  ;;  %v1695_v49 = vld [vmem:[%s5619_s2 + $0xa8] sm:$0xff]  ;;  %v1696_v50 = vld [vmem:[%s5619_s2 + $0xb0] sm:$0xff] }
 0x203   : > { %3789 = vmatprep.mubr.f32.mxu1 %v1014_v59  ;;  %v1185_v59 = vld [vmem:[%s6290_s10 + $0x150] sm:$0xff] }
 0x204   : > { %3790 = vmatmul.mubr.f32.gmra.mrb[6].mxu1 %v3711_v58  ;;  %4322 = vmatpush3.bf16.msra.mxu0 %v4319_v47  ;;  %v1200_v58 = vld [vmem:[%s5248_s8 + $0x40] sm:$0xff]  ;;  %v1693_v47 = vld [vmem:[%s5619_s2 + $0x98] sm:$0xff] }
 0x205   : > { %v3714_v63 = vpop.f32.mrb[8].mxu0  ;;  %4294 = vmatpush3.bf16.msra.mxu1 %v4291_v55  ;;  %v1184_v55 = vld [vmem:[%s6290_s10 + $0x148] sm:$0xff]  ;;  %4324 = vmatprep.subr.bf16.mxu0 %v4323_v52 }
 0x206   : > { %v1024_v0 = vpop.f32.mrb[9].mxu0  ;;  %4296 = vmatprep.subr.bf16.mxu1 %v4295_v60  ;;  %v4327_v57 = vpack.c.bf16 %v1184_v55, %v1183_v54  ;;  %v1700_v54 = vld [vmem:[%s5619_s2 + $0xd0] sm:$0xff]  ;;  %v1701_v55 = vld [vmem:[%s5619_s2 + $0xd8] sm:$0xff] }
 0x207   : > { %3792 = vmatprep.mubr.f32.mxu1 %v1024_v0  ;;  %v1187_v0 = vld [vmem:[%s6290_s10 + $0x160] sm:$0xff] }
 0x208   : > { %3793 = vmatmul.mubr.f32.gmra.mrb[8].mxu1 %v3714_v63  ;;  %4326 = vmatpush3.bf16.msra.mxu0 %v4323_v52  ;;  %v1202_v63 = vld [vmem:[%s5248_s8 + $0x50] sm:$0xff]  ;;  %v1698_v52 = vld [vmem:[%s5619_s2 + $0xc0] sm:$0xff] }
 0x209   : > { %v3717_v5 = vpop.f32.mrb[10].mxu0  ;;  %4298 = vmatpush3.bf16.msra.mxu1 %v4295_v60  ;;  %v1186_v60 = vld [vmem:[%s6290_s10 + $0x158] sm:$0xff]  ;;  %4328 = vmatprep.subr.bf16.mxu0 %v4327_v57 }
 0x20a   : > { %v1034_v6 = vpop.f32.mrb[11].mxu0  ;;  %4300 = vmatprep.subr.bf16.mxu1 %v4299_v2  ;;  %v4331_v62 = vpack.c.bf16 %v1186_v60, %v1185_v59  ;;  %v1705_v59 = vld [vmem:[%s5619_s2 + $0xf8] sm:$0xff]  ;;  %v1189_v60 = vld [vmem:[%s6290_s10 + $0x170] sm:$0xff] }
 0x20b   : > { %3795 = vmatprep.mubr.f32.mxu1 %v1034_v6  ;;  %v1205_v6 = vld [vmem:[%s5248_s8 + $0x68] sm:$0xff] }
 0x20c   : > { %3796 = vmatmul.mubr.f32.gmra.mrb[10].mxu1 %v3717_v5  ;;  %4330 = vmatpush3.bf16.msra.mxu0 %v4327_v57  ;;  %v1204_v5 = vld [vmem:[%s5248_s8 + $0x60] sm:$0xff]  ;;  %v1703_v57 = vld [vmem:[%s5619_s2 + $0xe8] sm:$0xff] }
 0x20d   : > { %v3720_v10 = vpop.f32.mrb[12].mxu0  ;;  %4302 = vmatpush3.bf16.msra.mxu1 %v4299_v2  ;;  %v1188_v2 = vld [vmem:[%s6290_s10 + $0x168] sm:$0xff]  ;;  %4332 = vmatprep.subr.bf16.mxu0 %v4331_v62 }
 0x20e   : > { %v1044_v11 = vpop.f32.mrb[13].mxu0  ;;  %4304 = vmatprep.subr.bf16.mxu1 %v4303_v7  ;;  %v4335_v4 = vpack.c.bf16 %v1188_v2, %v1187_v0 }
 0x20f   : > { %3798 = vmatprep.mubr.f32.mxu1 %v1044_v11  ;;  %v1210_v11 = vld [vmem:[%s5248_s8 + $0x90] sm:$0xff] }
 0x210   : > { %3799 = vmatmul.mubr.f32.gmra.mrb[12].mxu1 %v3720_v10  ;;  %4334 = vmatpush3.bf16.msra.mxu0 %v4331_v62  ;;  %v1209_v10 = vld [vmem:[%s5248_s8 + $0x88] sm:$0xff] }
 0x211   : > { %v3723_v13 = vpop.f32.mrb[14].mxu0  ;;  %4306 = vmatpush3.bf16.msra.mxu1 %v4303_v7  ;;  %4336 = vmatprep.subr.bf16.mxu0 %v4335_v4  ;;  %v1206_v7 = vld [vmem:[%s5248_s8 + $0x70] sm:$0xff] }
 0x212   : > { %v1054_v14 = vpop.f32.mrb[15].mxu0  ;;  %4308 = vmatprep.subr.bf16.mxu1 %v4307_v12 }
 0x213   : > { %3801 = vmatprep.mubr.f32.mxu1 %v1054_v14  ;;  %v1213_v14 = vld [vmem:[%s5248_s8 + $0xa8] sm:$0xff] }
 0x214   : > { %3802 = vmatmul.mubr.f32.gmra.mrb[14].mxu1 %v3723_v13  ;;  %4338 = vmatpush3.bf16.msra.mxu0 %v4335_v4  ;;  %v1212_v13 = vld [vmem:[%s5248_s8 + $0xa0] sm:$0xff] }
 0x215   : > { %v3726_v16 = vpop.f32.mrb[16].mxu0  ;;  %4310 = vmatpush3.bf16.msra.mxu1 %v4307_v12  ;;  %v1211_v12 = vld [vmem:[%s5248_s8 + $0x98] sm:$0xff] }
 0x216   : > { %v1064_v17 = vpop.f32.mrb[17].mxu0  ;;  %3908 = vmatprep.subr.mxu1 %v1191_v15 }
 0x217   : > { %3804 = vmatprep.mubr.f32.mxu1 %v1064_v17  ;;  %v1216_v17 = vld [vmem:[%s5248_s8 + $0xc0] sm:$0xff] }
 0x218   : > { %3805 = vmatmul.mubr.f32.gmra.mrb[16].mxu1 %v3726_v16  ;;  %v1215_v16 = vld [vmem:[%s5248_s8 + $0xb8] sm:$0xff] }
 0x219   : > { %v3729_v18 = vpop.f32.mrb[18].mxu0 }
 0x21a   : > { %v1074_v19 = vpop.f32.mrb[19].mxu0 }
 0x21b   : > { %3807 = vmatprep.mubr.f32.mxu1 %v1074_v19  ;;  %v1218_v19 = vld [vmem:[%s5248_s8 + $0xd0] sm:$0xff] }
 0x21c   : > { %3808 = vmatmul.mubr.f32.gmra.mrb[18].mxu1 %v3729_v18  ;;  %v1217_v18 = vld [vmem:[%s5248_s8 + $0xc8] sm:$0xff] }
 0x21d   : > { %v3732_v20 = vpop.f32.mrb[20].mxu0 }
 0x21e   : > { %v1084_v21 = vpop.f32.mrb[21].mxu0 }
 0x21f   : > { %3810 = vmatprep.mubr.f32.mxu1 %v1084_v21  ;;  %v1220_v21 = vld [vmem:[%s5248_s8 + $0xe0] sm:$0xff] }
 0x220   : > { %3811 = vmatmul.mubr.f32.gmra.mrb[20].mxu1 %v3732_v20  ;;  %v1219_v20 = vld [vmem:[%s5248_s8 + $0xd8] sm:$0xff] }
 0x221   : > { %v3735_v22 = vpop.f32.mrb[22].mxu0 }
 0x222   : > { %v1094_v23 = vpop.f32.mrb[23].mxu0 }
 0x223   : > { %3813 = vmatprep.mubr.f32.mxu1 %v1094_v23  ;;  %v1222_v23 = vld [vmem:[%s5248_s8 + $0xf0] sm:$0xff] }
 0x224   : > { %3814 = vmatmul.mubr.f32.gmra.mrb[22].mxu1 %v3735_v22  ;;  %v1221_v22 = vld [vmem:[%s5248_s8 + $0xe8] sm:$0xff] }
 0x225   : > { %v3738_v24 = vpop.f32.mrb[24].mxu0 }
 0x226   : > { %v1104_v25 = vpop.f32.mrb[25].mxu0 }
 0x227   : > { %3816 = vmatprep.mubr.f32.mxu1 %v1104_v25  ;;  %v1674_v25 = vld [vmem:[%s5619_s2] sm:$0xff] }
 0x228   : > { %3817 = vmatmul.mubr.f32.gmra.mrb[24].mxu1 %v3738_v24  ;;  %v1223_v24 = vld [vmem:[%s5248_s8 + $0xf8] sm:$0xff] }
 0x229   : > { %v3741_v26 = vpop.f32.mrb[26].mxu0 }
 0x22a   : > { %v1114_v27 = vpop.f32.mrb[27].mxu0 }
 0x22b   : > { %3819 = vmatprep.mubr.f32.mxu1 %v1114_v27  ;;  %v1676_v27 = vld [vmem:[%s5619_s2 + $0x10] sm:$0xff] }
 0x22c   : > { %3820 = vmatmul.mubr.f32.gmra.mrb[26].mxu1 %v3741_v26  ;;  %v1675_v26 = vld [vmem:[%s5619_s2 + $0x8] sm:$0xff] }
 0x22d   : > { %v3744_v28 = vpop.f32.mrb[28].mxu0 }
 0x22e   : > { %v1124_v29 = vpop.f32.mrb[29].mxu0 }
 0x22f   : > { %3822 = vmatprep.mubr.f32.mxu1 %v1124_v29  ;;  %v1678_v29 = vld [vmem:[%s5619_s2 + $0x20] sm:$0xff] }
 0x230   : > { %3823 = vmatmul.mubr.f32.gmra.mrb[28].mxu1 %v3744_v28  ;;  %v1677_v28 = vld [vmem:[%s5619_s2 + $0x18] sm:$0xff] }
 0x231   : > { %v3747_v30 = vpop.f32.mrb[30].mxu0 }
 0x232   : > { %v1134_v33 = vpop.f32.mrb[31].mxu0 }
 0x233   : > { %3825 = vmatprep.mubr.f32.mxu1 %v1134_v33  ;;  %v1680_v33 = vld [vmem:[%s5619_s2 + $0x30] sm:$0xff] }
 0x234   : > { %3826 = vmatmul.mubr.f32.gmra.mrb[30].mxu1 %v3747_v30  ;;  %v1679_v30 = vld [vmem:[%s5619_s2 + $0x28] sm:$0xff] }
 0x235   : > { %3860 = vmatprep.mubr.f32.mxu1 %v1192_v34  ;;  %v1681_v34 = vld [vmem:[%s5619_s2 + $0x38] sm:$0xff] }
 0x238   : > { %3861 = vmatmul.mubr.f32.vlgmr.msra.gmra.mrb[0].mxu1 %v1193_v39  ;;  %v1685_v39 = vld [vmem:[%s5619_s2 + $0x58] sm:$0xff] }
 0x239   : > { %3863 = vmatprep.mubr.f32.mxu1 %v1194_v42  ;;  %3909 = vmatpush3.msra.mxu1 %v1191_v15  ;;  %v1214_v15 = vld [vmem:[%s5248_s8 + $0xb0] sm:$0xff]  ;;  %s6295_s8 = sld [smem:[#allocation30_spill]] }
 0x23a   : > { %v1688_v42 = vld [vmem:[%s5619_s2 + $0x70] sm:$0xff] }
 0x23c   : > { %3864 = vmatmul.mubr.f32.gmra.mrb[2].mxu1 %v1195_v46  ;;  %v1692_v46 = vld [vmem:[%s5619_s2 + $0x90] sm:$0xff] }
 0x23d   : > { %3866 = vmatprep.mubr.f32.mxu1 %v1196_v48  ;;  %v1694_v48 = vld [vmem:[%s5619_s2 + $0xa0] sm:$0xff] }
 0x23f   : > { %s6167_s18 = scalar_lea.hbm %s6295_s8, %s3345_s7 }
 0x240   : > { %3867 = vmatmul.mubr.f32.gmra.mrb[4].mxu1 %v1197_v51  ;;  %v1697_v51 = vld [vmem:[%s5619_s2 + $0xb8] sm:$0xff] }
 0x241   : > { %3869 = vmatprep.mubr.f32.mxu1 %v1198_v53  ;;  %v1699_v53 = vld [vmem:[%s5619_s2 + $0xc8] sm:$0xff] }
 0x244   : > { %3870 = vmatmul.mubr.f32.gmra.mrb[6].mxu1 %v1199_v56  ;;  %v1702_v56 = vld [vmem:[%s5619_s2 + $0xe0] sm:$0xff] }
 0x245   : > { %3872 = vmatprep.mubr.f32.mxu1 %v1200_v58  ;;  %v1704_v58 = vld [vmem:[%s5619_s2 + $0xf0] sm:$0xff] }
 0x248   : > { %3873 = vmatmul.mubr.f32.gmra.mrb[8].mxu1 %v1201_v61  ;;  %v1190_v61 = vld [vmem:[%s6290_s10 + $0x178] sm:$0xff] }
 0x249   : > { %3875 = vmatprep.mubr.f32.mxu1 %v1202_v63  ;;  %v4339_v62 = vpack.c.bf16 %v1190_v61, %v1189_v60  ;;  %v5695_v63 = vld [vmem:[%s6292_s20] ss:$0 sm:$0xff] }
 0x24b   : > { %4340 = vmatprep.subr.bf16.mxu0 %v4339_v62 }
 0x24c   : > { %3876 = vmatmul.mubr.f32.gmra.mrb[10].mxu1 %v1203_v3  ;;  %4342 = vmatpush3.bf16.msra.mxu0 %v4339_v62 }
 0x24d   : > { %3878 = vmatprep.mubr.f32.mxu1 %v1204_v5 }
 0x250   : > { %3879 = vmatmul.mubr.f32.gmra.mrb[12].mxu1 %v1205_v6 }
 0x251   : > { %3881 = vmatprep.mubr.f32.mxu1 %v1206_v7 }
 0x254   : > { %3882 = vmatmul.mubr.f32.gmra.mrb[14].mxu1 %v1207_v8 }
 0x255   : > { %3884 = vmatprep.mubr.f32.mxu1 %v1208_v9 }
 0x258   : > { %3885 = vmatmul.mubr.f32.gmra.mrb[16].mxu1 %v1209_v10 }
 0x259   : > { %3887 = vmatprep.mubr.f32.mxu1 %v1210_v11 }
 0x25c   : > { %3888 = vmatmul.mubr.f32.gmra.mrb[18].mxu1 %v1211_v12 }
 0x25d   : > { %3890 = vmatprep.mubr.f32.mxu1 %v1212_v13 }
 0x260   : > { %3891 = vmatmul.mubr.f32.gmra.mrb[20].mxu1 %v1213_v14 }
 0x261   : > { %3893 = vmatprep.mubr.f32.mxu1 %v1214_v15 }
 0x264   : > { %3894 = vmatmul.mubr.f32.gmra.mrb[22].mxu1 %v1215_v16 }
 0x265   : > { %3896 = vmatprep.mubr.f32.mxu1 %v1216_v17 }
 0x268   : > { %3897 = vmatmul.mubr.f32.gmra.mrb[24].mxu1 %v1217_v18 }
 0x269   : > { %3899 = vmatprep.mubr.f32.mxu1 %v1218_v19 }
 0x26c   : > { %3900 = vmatmul.mubr.f32.gmra.mrb[26].mxu1 %v1219_v20 }
 0x26d   : > { %3902 = vmatprep.mubr.f32.mxu1 %v1220_v21 }
 0x270   : > { %3903 = vmatmul.mubr.f32.gmra.mrb[28].mxu1 %v1221_v22 }
 0x271   : > { %3905 = vmatprep.mubr.f32.mxu1 %v1222_v23 }
 0x274   : > { %3906 = vmatmul.mubr.f32.gmra.mrb[30].mxu1 %v1223_v24 }
 0x275   : > { %3910 = vmatprep.mubr.msk.f32.mxu1 %vm1706_vm0, %v1674_v25 }
 0x278   : > { %3911 = vmatmul.mubr.msk.f32.vlgmr.msra.gmra.mrb[0].mxu1 %vm1706_vm0, %v1675_v26 }
 0x279   : > { %3913 = vmatprep.mubr.msk.f32.mxu1 %vm1706_vm0, %v1676_v27 }
 0x27c   : > { %3914 = vmatmul.mubr.msk.f32.gmra.mrb[2].mxu1 %vm1706_vm0, %v1677_v28 }
 0x27d   : > { %3916 = vmatprep.mubr.msk.f32.mxu1 %vm1706_vm0, %v1678_v29 }
 0x280   : > { %3917 = vmatmul.mubr.msk.f32.gmra.mrb[4].mxu1 %vm1706_vm0, %v1679_v30 }
 0x281   : > { %3919 = vmatprep.mubr.msk.f32.mxu1 %vm1706_vm0, %v1680_v33 }
 0x284   : > { %3920 = vmatmul.mubr.msk.f32.gmra.mrb[6].mxu1 %vm1706_vm0, %v1681_v34 }
 0x285   : > { %3922 = vmatprep.mubr.msk.f32.mxu1 %vm1706_vm0, %v1682_v36 }
 0x288   : > { %3923 = vmatmul.mubr.msk.f32.gmra.mrb[8].mxu1 %vm1706_vm0, %v1683_v37 }
 0x289   : > { %3925 = vmatprep.mubr.msk.f32.mxu1 %vm1706_vm0, %v1684_v38 }
 0x28c   : > { %3926 = vmatmul.mubr.msk.f32.gmra.mrb[10].mxu1 %vm1706_vm0, %v1685_v39 }
 0x28d   : > { %3928 = vmatprep.mubr.msk.f32.mxu1 %vm1706_vm0, %v1686_v40 }
 0x290   : > { %3929 = vmatmul.mubr.msk.f32.gmra.mrb[12].mxu1 %vm1706_vm0, %v1687_v41 }
 0x291   : > { %3931 = vmatprep.mubr.msk.f32.mxu1 %vm1706_vm0, %v1688_v42 }
 0x294   : > { %3932 = vmatmul.mubr.msk.f32.gmra.mrb[14].mxu1 %vm1706_vm0, %v1689_v43 }
 0x295   : > { %3934 = vmatprep.mubr.msk.f32.mxu1 %vm1706_vm0, %v1690_v44 }
 0x298   : > { %3935 = vmatmul.mubr.msk.f32.gmra.mrb[16].mxu1 %vm1706_vm0, %v1691_v45 }
 0x299   : > { %3937 = vmatprep.mubr.msk.f32.mxu1 %vm1706_vm0, %v1692_v46 }
 0x29c   : > { %3938 = vmatmul.mubr.msk.f32.gmra.mrb[18].mxu1 %vm1706_vm0, %v1693_v47 }
 0x29d   : > { %3940 = vmatprep.mubr.msk.f32.mxu1 %vm1706_vm0, %v1694_v48 }
 0x2a0   : > { %3941 = vmatmul.mubr.msk.f32.gmra.mrb[20].mxu1 %vm1706_vm0, %v1695_v49 }
 0x2a1   : > { %3943 = vmatprep.mubr.msk.f32.mxu1 %vm1706_vm0, %v1696_v50 }
 0x2a4   : > { %3944 = vmatmul.mubr.msk.f32.gmra.mrb[22].mxu1 %vm1706_vm0, %v1697_v51 }
 0x2a5   : > { %3946 = vmatprep.mubr.msk.f32.mxu1 %vm1706_vm0, %v1698_v52 }
 0x2a8   : > { %3947 = vmatmul.mubr.msk.f32.gmra.mrb[24].mxu1 %vm1706_vm0, %v1699_v53 }
 0x2a9   : > { %3949 = vmatprep.mubr.msk.f32.mxu1 %vm1706_vm0, %v1700_v54 }
 0x2ac   : > { %3950 = vmatmul.mubr.msk.f32.gmra.mrb[26].mxu1 %vm1706_vm0, %v1701_v55 }
 0x2ad   : > { %3952 = vmatprep.mubr.msk.f32.mxu1 %vm1706_vm0, %v1702_v56 }
 0x2b0   : > { %3953 = vmatmul.mubr.msk.f32.gmra.mrb[28].mxu1 %vm1706_vm0, %v1703_v57 }
 0x2b1   : > { %3955 = vmatprep.mubr.msk.f32.mxu1 %vm1706_vm0, %v1704_v58 }
 0x2b4   : > { %3956 = vmatmul.mubr.msk.f32.gmra.mrb[30].mxu1 %vm1706_vm0, %v1705_v59 }
 0x2b5   : > { %4152 = vmatprep.mubr.msk.f32.mxu1 %vm4930_vm9, %v4927_v35 }
 0x34b   : > { %v3912_v0 = vpop.f32.mrb[0].mxu1 }
 0x34c   : > { %v2066_v2 = vadd.f32 %v3912_v0, %v5695_v63  ;;  %v1869_v3 = vpop.f32.mrb[1].mxu1 }
 0x34d   : > { %v2065_v4 = vadd.f32 %v5695_v63, %v1869_v3 }
 0x34e   : > { %v2098_v7 = vmax.f32 %v2066_v2, 0.0 }
 0x34f   : > { %v2097_v5 = vmax.f32 %v2065_v4, 0.0  ;;  %v3915_v6 = vpop.f32.mrb[2].mxu1 }
 0x350   : > { %v2068_v8 = vadd.f32 %v3915_v6, %v5695_v63  ;;  %v1879_v9 = vpop.f32.mrb[3].mxu1 }
 0x351   : > { %v2067_v10 = vadd.f32 %v5695_v63, %v1879_v9  ;;  %3990 = vmatprep.mubr.f32.mxu0 %v2097_v5 }
 0x352   : > { %3991 = vmatmul.mubr.f32.vlgmr.msra.gmra.mrb[32].mxu0 %v2098_v7  ;;  %v2100_v13 = vmax.f32 %v2068_v8, 0.0 }
 0x353   : > { %v2099_v11 = vmax.f32 %v2067_v10, 0.0  ;;  %v3918_v12 = vpop.f32.mrb[4].mxu1 }
 0x354   : > { %v2070_v14 = vadd.f32 %v3918_v12, %v5695_v63  ;;  %v1889_v15 = vpop.f32.mrb[5].mxu1 }
 0x355   : > { %v2069_v16 = vadd.f32 %v5695_v63, %v1889_v15  ;;  %3993 = vmatprep.mubr.f32.mxu0 %v2099_v11 }
 0x356   : > { %3994 = vmatmul.mubr.f32.gmra.mrb[34].mxu0 %v2100_v13  ;;  %v2102_v19 = vmax.f32 %v2070_v14, 0.0 }
 0x357   : > { %v2101_v17 = vmax.f32 %v2069_v16, 0.0  ;;  %v3921_v18 = vpop.f32.mrb[6].mxu1 }
 0x358   : > { %v2072_v20 = vadd.f32 %v3921_v18, %v5695_v63  ;;  %v1899_v21 = vpop.f32.mrb[7].mxu1 }
 0x359   : > { %v2071_v22 = vadd.f32 %v5695_v63, %v1899_v21  ;;  %3996 = vmatprep.mubr.f32.mxu0 %v2101_v17 }
 0x35a   : > { %3997 = vmatmul.mubr.f32.gmra.mrb[36].mxu0 %v2102_v19  ;;  %v2104_v25 = vmax.f32 %v2072_v20, 0.0 }
 0x35b   : > { %v2103_v23 = vmax.f32 %v2071_v22, 0.0  ;;  %v3924_v24 = vpop.f32.mrb[8].mxu1 }
 0x35c   : > { %v2074_v26 = vadd.f32 %v3924_v24, %v5695_v63  ;;  %v1909_v27 = vpop.f32.mrb[9].mxu1 }
 0x35d   : > { %v2073_v28 = vadd.f32 %v5695_v63, %v1909_v27  ;;  %3999 = vmatprep.mubr.f32.mxu0 %v2103_v23 }
 0x35e   : > { %4000 = vmatmul.mubr.f32.gmra.mrb[38].mxu0 %v2104_v25  ;;  %v2106_v33 = vmax.f32 %v2074_v26, 0.0 }
 0x35f   : > { %v2105_v29 = vmax.f32 %v2073_v28, 0.0  ;;  %v3927_v30 = vpop.f32.mrb[10].mxu1 }
 0x360   : > { %v2076_v34 = vadd.f32 %v3927_v30, %v5695_v63  ;;  %v1919_v36 = vpop.f32.mrb[11].mxu1 }
 0x361   : > { %v2075_v37 = vadd.f32 %v5695_v63, %v1919_v36  ;;  %4002 = vmatprep.mubr.f32.mxu0 %v2105_v29 }
 0x362   : > { %4003 = vmatmul.mubr.f32.gmra.mrb[40].mxu0 %v2106_v33  ;;  %v2108_v40 = vmax.f32 %v2076_v34, 0.0 }
 0x363   : > { %v2107_v38 = vmax.f32 %v2075_v37, 0.0  ;;  %v3930_v39 = vpop.f32.mrb[12].mxu1 }
 0x364   : > { %v2078_v41 = vadd.f32 %v3930_v39, %v5695_v63  ;;  %v1929_v42 = vpop.f32.mrb[13].mxu1 }
 0x365   : > { %v2077_v43 = vadd.f32 %v5695_v63, %v1929_v42  ;;  %4005 = vmatprep.mubr.f32.mxu0 %v2107_v38  ;;  %v527_v42 = vld [vmem:[%s427_s15] sm:$0x3]  ;;  %s485_s15 = scalar_lea.vmem [#allocation10], %s4559_s22  ;;  %s4787_s22 = sshll.u32 %s4931_s28, 4  ;;  %s4788_s22 = int_to_ptr.vmem [resolvable:$false] %s4787_s22 }
 0x366   : > { %4006 = vmatmul.mubr.f32.gmra.mrb[42].mxu0 %v2108_v40  ;;  %v2110_v46 = vmax.f32 %v2078_v41, 0.0  ;;  %v5730_v41 = vshrl.u32 %v594_v31, 7  ;;  %s3063_s30 = sshll.u32 %s485_s15, 4  ;;  %s4789_s12 = scalar_lea.vmem %s4788_s22, 768  ;;  %s6169_s30 = int_to_ptr.vmem [resolvable:$true] %s3063_s30 }
 0x367   : > { %v2109_v44 = vmax.f32 %v2077_v43, 0.0  ;;  %v3933_v45 = vpop.f32.mrb[14].mxu1  ;;  %v529_v43 = vsub.s32 %v527_v42, %v5265_v1  ;;  %s4783_s11 = scalar_lea.vmem %s6169_s30, 384  ;;  %p4790_p6 = scmp.lt.s32.totalorder %s6169_s30, %s4788_s22 }
 0x368   : > { %v2080_v47 = vadd.f32 %v3933_v45, %v5695_v63  ;;  %v1939_v48 = vpop.f32.mrb[15].mxu1  ;;  %v600_v45 = vsub.s32 0, %v5730_v41  ;;  %v5747_v31 = vadd.s32 8, %v5730_v41  ;;  %v5754_v1 = vadd.s32 16, %v5730_v41  ;;  %p4784_p0 = scmp.ne.s32.totalorder %s6169_s30, %s4783_s11  ;;  %p4791_p4 = scmp.lt.s32.totalorder %s4789_s12, %s4783_s11 }
 0x369   : > { %v2079_v49 = vadd.f32 %v5695_v63, %v1939_v48  ;;  %4008 = vmatprep.mubr.f32.mxu0 %v2109_v44  ;;  %v604_v44 = vsub.s32 1, %v5730_v41  ;;  %v4929_v48 = vmov 0.0|0.0  }
 0x36a   : > { %4009 = vmatmul.mubr.f32.gmra.mrb[44].mxu0 %v2110_v46  ;;  %v2112_v52 = vmax.f32 %v2080_v47, 0.0  ;;  %v4928_v47 = vmov 1.0   ;;  %4423 = vmatprep.subr.bf16.mxu1 %v4929_v48  ;;  %p4785_p3 = pnand %p4784_p0, %p6296_p12  ;;  %p4792_p13 = por %p4791_p4, %p4790_p6 }
 0x36b   : > { %v2111_v50 = vmax.f32 %v2079_v49, 0.0  ;;  %v3936_v51 = vpop.f32.mrb[16].mxu1  ;;  %v5737_v46 = vrot.slane %v529_v43, %v604_v44  ;;  %v5764_v49 = vld [vmem:[%s6292_s20 + $0x1] ss:$0 sm:$0xff] }
 0x36c   : > { %v2082_v53 = vadd.f32 %v3936_v51, %v5695_v63  ;;  %v1949_v54 = vpop.f32.mrb[17].mxu1  ;;  %p4786_p11 = pneg %p4785_p3 }
 0x36d   : > { %v2081_v55 = vadd.f32 %v5695_v63, %v1949_v54  ;;  %4011 = vmatprep.mubr.f32.mxu0 %v2111_v50  ;;  %vm607_vm3 = vcmp.eq.s32.totalorder %v5730_v41, %v5737_v46  ;;  %vm609_vm5 = vcmp.eq.s32.totalorder %v5747_v31, %v5737_v46  ;;  %vm611_vm7 = vcmp.eq.s32.totalorder %v5754_v1, %v5737_v46 }
 0x36e   : > { %4012 = vmatmul.mubr.f32.gmra.mrb[46].mxu0 %v2112_v52  ;;  %v2114_v58 = vmax.f32 %v2082_v53, 0.0  ;;  %p4793_p7 = pnand %p4792_p13, %p4786_p11 }
 0x36f   : > { %v2113_v56 = vmax.f32 %v2081_v55, 0.0  ;;  %v3939_v57 = vpop.f32.mrb[18].mxu1 }
 0x370   : > { %v2084_v59 = vadd.f32 %v3939_v57, %v5695_v63  ;;  %v1959_v60 = vpop.f32.mrb[19].mxu1 }
 0x371   : > { %v2083_v61 = vadd.f32 %v5695_v63, %v1959_v60  ;;  %4014 = vmatprep.mubr.f32.mxu0 %v2113_v56 }
 0x372   : > { %4015 = vmatmul.mubr.f32.gmra.mrb[48].mxu0 %v2114_v58  ;;  %v2116_v2 = vmax.f32 %v2084_v59, 0.0 }
 0x373   : > { %v2115_v62 = vmax.f32 %v2083_v61, 0.0  ;;  %v3942_v0 = vpop.f32.mrb[20].mxu1 }
 0x374   : > { %v2086_v3 = vadd.f32 %v3942_v0, %v5695_v63  ;;  %v1969_v4 = vpop.f32.mrb[21].mxu1 }
 0x375   : > { %v2085_v5 = vadd.f32 %v5695_v63, %v1969_v4  ;;  %4017 = vmatprep.mubr.f32.mxu0 %v2115_v62 }
 0x376   : > { %4018 = vmatmul.mubr.f32.gmra.mrb[50].mxu0 %v2116_v2  ;;  %v2118_v8 = vmax.f32 %v2086_v3, 0.0 }
 0x377   : > { %v2117_v6 = vmax.f32 %v2085_v5, 0.0  ;;  %v3945_v7 = vpop.f32.mrb[22].mxu1 }
 0x378   : > { %v2088_v9 = vadd.f32 %v3945_v7, %v5695_v63  ;;  %v1979_v10 = vpop.f32.mrb[23].mxu1 }
 0x379   : > { %v2087_v11 = vadd.f32 %v5695_v63, %v1979_v10  ;;  %4020 = vmatprep.mubr.f32.mxu0 %v2117_v6 }
 0x37a   : > { %4021 = vmatmul.mubr.f32.gmra.mrb[52].mxu0 %v2118_v8  ;;  %v2120_v14 = vmax.f32 %v2088_v9, 0.0 }
 0x37b   : > { %v2119_v12 = vmax.f32 %v2087_v11, 0.0  ;;  %v3948_v13 = vpop.f32.mrb[24].mxu1 }
 0x37c   : > { %v2090_v15 = vadd.f32 %v3948_v13, %v5695_v63  ;;  %v1989_v16 = vpop.f32.mrb[25].mxu1 }
 0x37d   : > { %v2089_v17 = vadd.f32 %v5695_v63, %v1989_v16  ;;  %4023 = vmatprep.mubr.f32.mxu0 %v2119_v12 }
 0x37e   : > { %4024 = vmatmul.mubr.f32.gmra.mrb[54].mxu0 %v2120_v14  ;;  %v2122_v20 = vmax.f32 %v2090_v15, 0.0 }
 0x37f   : > { %v2121_v18 = vmax.f32 %v2089_v17, 0.0  ;;  %v3951_v19 = vpop.f32.mrb[26].mxu1 }
 0x380   : > { %v2092_v21 = vadd.f32 %v3951_v19, %v5695_v63  ;;  %v1999_v22 = vpop.f32.mrb[27].mxu1 }
 0x381   : > { %v2091_v23 = vadd.f32 %v5695_v63, %v1999_v22  ;;  %4026 = vmatprep.mubr.f32.mxu0 %v2121_v18 }
 0x382   : > { %4027 = vmatmul.mubr.f32.gmra.mrb[56].mxu0 %v2122_v20  ;;  %v2124_v26 = vmax.f32 %v2092_v21, 0.0 }
 0x383   : > { %v2123_v24 = vmax.f32 %v2091_v23, 0.0  ;;  %v3954_v25 = vpop.f32.mrb[28].mxu1 }
 0x384   : > { %v2094_v27 = vadd.f32 %v3954_v25, %v5695_v63  ;;  %v2009_v28 = vpop.f32.mrb[29].mxu1 }
 0x385   : > { %v2093_v29 = vadd.f32 %v5695_v63, %v2009_v28  ;;  %4029 = vmatprep.mubr.f32.mxu0 %v2123_v24 }
 0x386   : > { %4030 = vmatmul.mubr.f32.gmra.mrb[58].mxu0 %v2124_v26  ;;  %v2126_v34 = vmax.f32 %v2094_v27, 0.0 }
 0x387   : > { %v2125_v30 = vmax.f32 %v2093_v29, 0.0  ;;  %v3957_v33 = vpop.f32.mrb[30].mxu1 }
 0x388   : > { %v2096_v36 = vadd.f32 %v3957_v33, %v5695_v63  ;;  %v2019_v37 = vpop.f32.mrb[31].mxu1 }
 0x389   : > { %v2095_v38 = vadd.f32 %v5695_v63, %v2019_v37  ;;  %4032 = vmatprep.mubr.f32.mxu0 %v2125_v30  ;;  %v5739_v63 = vrot.slane %v529_v43, %v600_v45 }
 0x38a   : > { %4033 = vmatmul.mubr.f32.gmra.mrb[60].mxu0 %v2126_v34  ;;  %v2128_v40 = vmax.f32 %v2096_v36, 0.0 }
 0x38b   : > { %v2127_v39 = vmax.f32 %v2095_v38, 0.0  ;;  %vm606_vm4 = vcmp.eq.s32.totalorder %v5730_v41, %v5739_v63  ;;  %vm608_vm6 = vcmp.eq.s32.totalorder %v5747_v31, %v5739_v63  ;;  %vm610_vm8 = vcmp.eq.s32.totalorder %v5754_v1, %v5739_v63  ;;  %v2481_v31 = vld [vmem:[%s6293_s1 + $0xc0] sm:$0xff]  ;;  %v2483_v63 = vld [vmem:[%s6293_s1 + $0xd0] sm:$0xff] }
 0x38d   : > { %4035 = vmatprep.mubr.f32.mxu0 %v2127_v39 }
 0x38e   : > { %4036 = vmatmul.mubr.f32.gmra.mrb[62].mxu0 %v2128_v40 }
 0x38f   : > { %3325 = vmatprep.mubr.msk.f32.mxu0 %vm607_vm3, %v4928_v47 }
 0x425   : > { %v3992_v50 = vpop.f32.mrb[32].mxu0 }
 0x426   : > { %v2206_v51 = vadd.f32 %v3992_v50, %v5764_v49  ;;  %v2200_v52 = vpop.f32.mrb[33].mxu0 }
 0x427   : > { %v2201_v53 = vadd.f32 %v5764_v49, %v2200_v52 }
 0x429   : > { %v4345_v54 = vpack.c.bf16 %v2206_v51, %v2201_v53  ;;  %v3995_v55 = vpop.f32.mrb[34].mxu0 }
 0x42a   : > { %v2216_v56 = vadd.f32 %v3995_v55, %v5764_v49  ;;  %v2210_v57 = vpop.f32.mrb[35].mxu0 }
 0x42b   : > { %v2211_v58 = vadd.f32 %v5764_v49, %v2210_v57 }
 0x42d   : > { %v4349_v59 = vpack.c.bf16 %v2216_v56, %v2211_v58  ;;  %v3998_v60 = vpop.f32.mrb[36].mxu0 }
 0x42e   : > { %v2226_v61 = vadd.f32 %v3998_v60, %v5764_v49  ;;  %v2220_v62 = vpop.f32.mrb[37].mxu0 }
 0x42f   : > { %v2221_v0 = vadd.f32 %v5764_v49, %v2220_v62 }
 0x431   : > { %v4353_v2 = vpack.c.bf16 %v2226_v61, %v2221_v0  ;;  %v4001_v3 = vpop.f32.mrb[38].mxu0 }
 0x432   : > { %v2236_v4 = vadd.f32 %v4001_v3, %v5764_v49  ;;  %v2230_v5 = vpop.f32.mrb[39].mxu0 }
 0x433   : > { %v2231_v6 = vadd.f32 %v5764_v49, %v2230_v5 }
 0x435   : > { %v4357_v7 = vpack.c.bf16 %v2236_v4, %v2231_v6  ;;  %v4004_v8 = vpop.f32.mrb[40].mxu0 }
 0x436   : > { %v2246_v9 = vadd.f32 %v4004_v8, %v5764_v49  ;;  %v2240_v10 = vpop.f32.mrb[41].mxu0 }
 0x437   : > { %v2241_v11 = vadd.f32 %v5764_v49, %v2240_v10 }
 0x439   : > { %v4361_v12 = vpack.c.bf16 %v2246_v9, %v2241_v11  ;;  %v4007_v13 = vpop.f32.mrb[42].mxu0 }
 0x43a   : > { %v2256_v14 = vadd.f32 %v4007_v13, %v5764_v49  ;;  %v2250_v15 = vpop.f32.mrb[43].mxu0 }
 0x43b   : > { %v2251_v16 = vadd.f32 %v5764_v49, %v2250_v15  ;;  %v2474_v15 = vld [vmem:[%s6293_s1 + $0x88] sm:$0xff] }
 0x43d   : > { %v4365_v17 = vpack.c.bf16 %v2256_v14, %v2251_v16  ;;  %v4010_v18 = vpop.f32.mrb[44].mxu0 }
 0x43e   : > { %v2266_v19 = vadd.f32 %v4010_v18, %v5764_v49  ;;  %v2260_v20 = vpop.f32.mrb[45].mxu0 }
 0x43f   : > { %v2261_v21 = vadd.f32 %v5764_v49, %v2260_v20  ;;  %v2478_v20 = vld [vmem:[%s6293_s1 + $0xa8] sm:$0xff] }
 0x441   : > { %v4369_v22 = vpack.c.bf16 %v2266_v19, %v2261_v21  ;;  %v4013_v23 = vpop.f32.mrb[46].mxu0  ;;  %v2477_v19 = vld [vmem:[%s6293_s1 + $0xa0] sm:$0xff]  ;;  %v2479_v21 = vld [vmem:[%s6293_s1 + $0xb0] sm:$0xff] }
 0x442   : > { %v2276_v24 = vadd.f32 %v4013_v23, %v5764_v49  ;;  %v2270_v25 = vpop.f32.mrb[47].mxu0  ;;  %v4382_v41 = vpack.c.bf16 %v2478_v20, %v2477_v19  ;;  %v2482_v23 = vld [vmem:[%s6293_s1 + $0xc8] sm:$0xff] }
 0x443   : > { %v2271_v26 = vadd.f32 %v5764_v49, %v2270_v25  ;;  %v2485_v25 = vld [vmem:[%s6293_s1 + $0xe0] sm:$0xff] }
 0x445   : > { %v4373_v27 = vpack.c.bf16 %v2276_v24, %v2271_v26  ;;  %v4016_v28 = vpop.f32.mrb[48].mxu0  ;;  %v4388_v24 = vpack.c.bf16 %v2482_v23, %v2481_v31  ;;  %v2486_v26 = vld [vmem:[%s6293_s1 + $0xe8] sm:$0xff]  ;;  %v2468_v31 = vld [vmem:[%s6293_s1 + $0x58] sm:$0xff] }
 0x446   : > { %v2286_v29 = vadd.f32 %v4016_v28, %v5764_v49  ;;  %v2280_v30 = vpop.f32.mrb[49].mxu0  ;;  %v2505_v28 = vld [vmem:[%s6293_s1 + $0x180] sm:$0xff] }
 0x447   : > { %v2281_v33 = vadd.f32 %v5764_v49, %v2280_v30 }
 0x449   : > { %v4343_v34 = vpack.c.bf16 %v2286_v29, %v2281_v33  ;;  %v4019_v36 = vpop.f32.mrb[50].mxu0  ;;  %v2506_v29 = vld [vmem:[%s6293_s1 + $0x188] sm:$0xff]  ;;  %v2507_v33 = vld [vmem:[%s6293_s1 + $0x190] sm:$0xff] }
 0x44a   : > { %v2296_v37 = vadd.f32 %v4019_v36, %v5764_v49  ;;  %v2290_v38 = vpop.f32.mrb[51].mxu0  ;;  %v4424_v30 = vpack.c.bf16 %v2506_v29, %v2505_v28  ;;  %v2490_v28 = vld [vmem:[%s6293_s1 + $0x108] sm:$0xff]  ;;  %v6009_v29 = vld [vmem:[%s5287_s21] sm:$0xff] }
 0x44b   : > { %v2291_v39 = vadd.f32 %v5764_v49, %v2290_v38  ;;  %4344 = vmatprep.subr.bf16.mxu0 %v4343_v34  ;;  %v2508_v34 = vld [vmem:[%s6293_s1 + $0x198] sm:$0xff]  ;;  %v2510_v38 = vld [vmem:[%s6293_s1 + $0x1a8] sm:$0xff] }
 0x44c   : > { %4346 = vmatpush3.bf16.msra.mxu0 %v4345_v54  ;;  %4425 = vmatpush3.bf16.msra.mxu1 %v4424_v30  ;;  %v4427_v36 = vpack.c.bf16 %v2508_v34, %v2507_v33  ;;  %v2491_v33 = vld [vmem:[%s6293_s1 + $0x110] sm:$0xff]  ;;  %v2492_v34 = vld [vmem:[%s6293_s1 + $0x118] sm:$0xff] }
 0x44d   : > { %v4347_v40 = vpack.c.bf16 %v2296_v37, %v2291_v39  ;;  %v4022_v42 = vpop.f32.mrb[52].mxu0  ;;  %4426 = vmatprep.subr.bf16.mxu1 %v4929_v48  ;;  %v2509_v37 = vld [vmem:[%s6293_s1 + $0x1a0] sm:$0xff] }
 0x44e   : > { %v2306_v43 = vadd.f32 %v4022_v42, %v5764_v49  ;;  %v2300_v44 = vpop.f32.mrb[53].mxu0  ;;  %v4430_v39 = vpack.c.bf16 %v2510_v38, %v2509_v37  ;;  %v2512_v42 = vld [vmem:[%s6293_s1 + $0x1b8] sm:$0xff]  ;;  %v6022_v37 = vld [vmem:[%s5287_s21 + $0x8] sm:$0xff]  ;;  %v2493_v38 = vld [vmem:[%s6293_s1 + $0x120] sm:$0xff] }
 0x44f   : > { %v2301_v45 = vadd.f32 %v5764_v49, %v2300_v44  ;;  %4348 = vmatprep.subr.bf16.mxu0 %v4347_v40  ;;  %v2511_v40 = vld [vmem:[%s6293_s1 + $0x1b0] sm:$0xff]  ;;  %v2513_v44 = vld [vmem:[%s6293_s1 + $0x1c0] sm:$0xff] }
 0x450   : > { %4350 = vmatpush3.bf16.msra.mxu0 %v4349_v59  ;;  %4428 = vmatpush3.bf16.msra.mxu1 %v4427_v36  ;;  %v4451_v36 = vpack.c.bf16 %v2492_v34, %v2491_v33 }
 0x451   : > { %v4351_v50 = vpack.c.bf16 %v2306_v43, %v2301_v45  ;;  %v4025_v51 = vpop.f32.mrb[54].mxu0  ;;  %4429 = vmatprep.subr.bf16.mxu1 %v4929_v48  ;;  %v4433_v43 = vpack.c.bf16 %v2512_v42, %v2511_v40  ;;  %v2514_v45 = vld [vmem:[%s6293_s1 + $0x1c8] sm:$0xff]  ;;  %v6035_v42 = vld [vmem:[%s5287_s21 + $0x10] sm:$0xff]  ;;  %s6171_s21 = scalar_lea.sflag [#allocation7], %s483_s3 }
 0x452   : > { %v2316_v52 = vadd.f32 %v4025_v51, %v5764_v49  ;;  %v2310_v53 = vpop.f32.mrb[55].mxu0  ;;  %v2515_v51 = vld [vmem:[%s6293_s1 + $0x1d0] sm:$0xff] }
 0x453   : > { %v2311_v55 = vadd.f32 %v5764_v49, %v2310_v53  ;;  %4352 = vmatprep.subr.bf16.mxu0 %v4351_v50  ;;  %v4436_v50 = vpack.c.bf16 %v2514_v45, %v2513_v44  ;;  %v2496_v44 = vld [vmem:[%s6293_s1 + $0x138] sm:$0xff] }
 0x454   : > { %4354 = vmatpush3.bf16.msra.mxu0 %v4353_v2  ;;  %4431 = vmatpush3.bf16.msra.mxu1 %v4430_v39  ;;  %v2494_v39 = vld [vmem:[%s6293_s1 + $0x128] sm:$0xff] }
 0x455   : > { %v4355_v56 = vpack.c.bf16 %v2316_v52, %v2311_v55  ;;  %v4028_v54 = vpop.f32.mrb[56].mxu0  ;;  %4432 = vmatprep.subr.bf16.mxu1 %v4929_v48  ;;  %v2516_v52 = vld [vmem:[%s6293_s1 + $0x1d8] sm:$0xff]  ;;  %v2517_v55 = vld [vmem:[%s6293_s1 + $0x1e0] sm:$0xff]  ;;  %v4454_v40 = vpack.c.bf16 %v2494_v39, %v2493_v38 }
 0x456   : > { %v2326_v57 = vadd.f32 %v4028_v54, %v5764_v49  ;;  %v2320_v58 = vpop.f32.mrb[57].mxu0  ;;  %v4439_v53 = vpack.c.bf16 %v2516_v52, %v2515_v51  ;;  %v2498_v51 = vld [vmem:[%s6293_s1 + $0x148] sm:$0xff] }
 0x457   : > { %v2321_v60 = vadd.f32 %v5764_v49, %v2320_v58  ;;  %4356 = vmatprep.subr.bf16.mxu0 %v4355_v56  ;;  %v2518_v56 = vld [vmem:[%s6293_s1 + $0x1e8] sm:$0xff]  ;;  %v2488_v58 = vld [vmem:[%s6293_s1 + $0xf8] sm:$0xff] }
 0x458   : > { %4358 = vmatpush3.bf16.msra.mxu0 %v4357_v7  ;;  %4434 = vmatpush3.bf16.msra.mxu1 %v4433_v43  ;;  %v4442_v54 = vpack.c.bf16 %v2518_v56, %v2517_v55  ;;  %v2495_v43 = vld [vmem:[%s6293_s1 + $0x130] sm:$0xff]  ;;  %v2500_v55 = vld [vmem:[%s6293_s1 + $0x158] sm:$0xff] }
 0x459   : > { %v4359_v61 = vpack.c.bf16 %v2326_v57, %v2321_v60  ;;  %v4031_v59 = vpop.f32.mrb[58].mxu0  ;;  %4435 = vmatprep.subr.bf16.mxu1 %v4929_v48  ;;  %v2487_v57 = vld [vmem:[%s6293_s1 + $0xf0] sm:$0xff]  ;;  %v4457_v45 = vpack.c.bf16 %v2496_v44, %v2495_v43  ;;  %v3335_v44 = vld [vmem:[%s6294_s19 + $0x1] ss:$0 sm:$0xff] }
 0x45a   : > { %v2336_v62 = vadd.f32 %v4031_v59, %v5764_v49  ;;  %v2330_v0 = vpop.f32.mrb[59].mxu0  ;;  %v4397_v60 = vpack.c.bf16 %v2488_v58, %v2487_v57  ;;  %v2520_v59 = vld [vmem:[%s6293_s1 + $0x1f8] sm:$0xff]  ;;  %v2502_v57 = vld [vmem:[%s6293_s1 + $0x168] sm:$0xff] }
 0x45b   : > { %v2331_v3 = vadd.f32 %v5764_v49, %v2330_v0  ;;  %4360 = vmatprep.subr.bf16.mxu0 %v4359_v61  ;;  %v2519_v61 = vld [vmem:[%s6293_s1 + $0x1f0] sm:$0xff]  ;;  %v2457_v0 = vld [vmem:[%s6293_s1] sm:$0xff] }
 0x45c   : > { %4362 = vmatpush3.bf16.msra.mxu0 %v4361_v12  ;;  %v2473_v12 = vld [vmem:[%s6293_s1 + $0x80] sm:$0xff]  ;;  %4437 = vmatpush3.bf16.msra.mxu1 %v4436_v50 }
 0x45d   : > { %v4363_v4 = vpack.c.bf16 %v2336_v62, %v2331_v3  ;;  %v4034_v2 = vpop.f32.mrb[60].mxu0  ;;  %v4376_v16 = vpack.c.bf16 %v2474_v15, %v2473_v12  ;;  %4438 = vmatprep.subr.bf16.mxu1 %v4929_v48  ;;  %v4445_v62 = vpack.c.bf16 %v2520_v59, %v2519_v61  ;;  %v2458_v3 = vld [vmem:[%s6293_s1 + $0x8] sm:$0xff]  ;;  %v2497_v50 = vld [vmem:[%s6293_s1 + $0x140] sm:$0xff]  ;;  %v2504_v61 = vld [vmem:[%s6293_s1 + $0x178] sm:$0xff] }
 0x45e   : > { %v2346_v5 = vadd.f32 %v4034_v2, %v5764_v49  ;;  %v2340_v6 = vpop.f32.mrb[61].mxu0  ;;  %v4460_v52 = vpack.c.bf16 %v2498_v51, %v2497_v50 }
 0x45f   : > { %v2341_v8 = vadd.f32 %v5764_v49, %v2340_v6  ;;  %4364 = vmatprep.subr.bf16.mxu0 %v4363_v4 }
 0x460   : > { %4366 = vmatpush3.bf16.msra.mxu0 %v4365_v17  ;;  %v2476_v17 = vld [vmem:[%s6293_s1 + $0x98] sm:$0xff]  ;;  %4440 = vmatpush3.bf16.msra.mxu1 %v4439_v53  ;;  %v2499_v53 = vld [vmem:[%s6293_s1 + $0x150] sm:$0xff] }
 0x461   : > { %v4367_v9 = vpack.c.bf16 %v2346_v5, %v2341_v8  ;;  %v4037_v7 = vpop.f32.mrb[62].mxu0  ;;  %4441 = vmatprep.subr.bf16.mxu1 %v4929_v48  ;;  %v4400_v5 = vpack.c.bf16 %v2458_v3, %v2457_v0  ;;  %v2459_v8 = vld [vmem:[%s6293_s1 + $0x10] sm:$0xff]  ;;  %v4463_v56 = vpack.c.bf16 %v2500_v55, %v2499_v53  ;;  %v2522_v0 = vld [vmem:[%s6293_s1 + $0x208] sm:$0xff] }
 0x462   : > { %v2356_v10 = vadd.f32 %v4037_v7, %v5764_v49  ;;  %v2350_v11 = vpop.f32.mrb[63].mxu0 }
 0x463   : > { %v2351_v13 = vadd.f32 %v5764_v49, %v2350_v11  ;;  %4368 = vmatprep.subr.bf16.mxu0 %v4367_v9  ;;  %v2475_v49 = vld [vmem:[%s6293_s1 + $0x90] sm:$0xff]  ;;  %v2460_v9 = vld [vmem:[%s6293_s1 + $0x18] sm:$0xff] }
 0x464   : > { %4370 = vmatpush3.bf16.msra.mxu0 %v4369_v22  ;;  %v4379_v18 = vpack.c.bf16 %v2476_v17, %v2475_v49  ;;  %v2480_v22 = vld [vmem:[%s6293_s1 + $0xb8] sm:$0xff]  ;;  %4443 = vmatpush3.bf16.msra.mxu1 %v4442_v54  ;;  %v2463_v17 = vld [vmem:[%s6293_s1 + $0x30] sm:$0xff]  ;;  %v2501_v54 = vld [vmem:[%s6293_s1 + $0x160] sm:$0xff] }
 0x465   : > { %v4371_v14 = vpack.c.bf16 %v2356_v10, %v2351_v13  ;;  %v4385_v46 = vpack.c.bf16 %v2480_v22, %v2479_v21  ;;  %4444 = vmatprep.subr.bf16.mxu1 %v4929_v48  ;;  %v4403_v10 = vpack.c.bf16 %v2460_v9, %v2459_v8  ;;  %v2461_v13 = vld [vmem:[%s6293_s1 + $0x20] sm:$0xff]  ;;  %v2466_v21 = vld [vmem:[%s6293_s1 + $0x48] sm:$0xff]  ;;  %v4466_v58 = vpack.c.bf16 %v2502_v57, %v2501_v54 }
 0x466   : > { %v2526_v8 = vld [vmem:[%s6293_s1 + $0x228] sm:$0xff] }
 0x467   : > { %4372 = vmatprep.subr.bf16.mxu0 %v4371_v14  ;;  %v2462_v14 = vld [vmem:[%s6293_s1 + $0x28] sm:$0xff] }
 0x468   : > { %4374 = vmatpush3.bf16.msra.mxu0 %v4373_v27  ;;  %v4394_v27 = vpack.c.bf16 %v2486_v26, %v2485_v25  ;;  %4446 = vmatpush3.bf16.msra.mxu1 %v4445_v62  ;;  %v2472_v25 = vld [vmem:[%s6293_s1 + $0x78] sm:$0xff]  ;;  %v2521_v62 = vld [vmem:[%s6293_s1 + $0x200] sm:$0xff] }
 0x469   : > { %4375 = vmatprep.subr.bf16.mxu0 %v4929_v48  ;;  %4471 = vmatprep.subr.bf16.mxu1 %v4929_v48  ;;  %v4472_v3 = vpack.c.bf16 %v2522_v0, %v2521_v62 }
 0x46b   : > { %3326 = vmatmul.mubr.msk.f32.vlgmr.msra.gmra.mrb[64].mxu0 %vm606_vm4, %v4928_v47 }
 0x46c   : > { %3327 = vmatprep.mubr.msk.f32.mxu0 %vm609_vm5, %v4928_v47  ;;  %4377 = vmatpush3.bf16.msra.mxu0 %v4376_v16  ;;  %v4406_v16 = vpack.c.bf16 %v2462_v14, %v2461_v13  ;;  %v2529_v13 = vld [vmem:[%s6293_s1 + $0x240] sm:$0xff]  ;;  %v2530_v14 = vld [vmem:[%s6293_s1 + $0x248] sm:$0xff] }
 0x46d   : > { %4378 = vmatprep.subr.bf16.mxu0 %v4929_v48 }
 0x46f   : > { %3328 = vmatmul.mubr.msk.f32.gmra.mrb[66].mxu0 %vm608_vm6, %v4928_v47 }
 0x470   : > { %3329 = vmatprep.mubr.msk.f32.mxu0 %vm611_vm7, %v4928_v47  ;;  %4380 = vmatpush3.bf16.msra.mxu0 %v4379_v18  ;;  %v2464_v18 = vld [vmem:[%s6293_s1 + $0x38] sm:$0xff] }
 0x471   : > { %4381 = vmatprep.subr.bf16.mxu0 %v4929_v48  ;;  %v4409_v20 = vpack.c.bf16 %v2464_v18, %v2463_v17  ;;  %v2533_v17 = vld [vmem:[%s6293_s1 + $0x260] sm:$0xff]  ;;  %v2534_v18 = vld [vmem:[%s6293_s1 + $0x268] sm:$0xff] }
 0x473   : > { %3330 = vmatmul.mubr.msk.f32.gmra.mrb[68].mxu0 %vm610_vm8, %v4928_v47  ;;  %v2484_v47 = vld [vmem:[%s6293_s1 + $0xd8] sm:$0xff] }
 0x474   : > { %4383 = vmatpush3.bf16.msra.mxu0 %v4382_v41  ;;  %v4391_v1 = vpack.c.bf16 %v2484_v47, %v2483_v63  ;;  %4070 = vmatprep.mubr.msk.f32.mxu0 %vm4930_vm9, %v4927_v35  ;;  %v2465_v41 = vld [vmem:[%s6293_s1 + $0x40] sm:$0xff]  ;;  %v2470_v63 = vld [vmem:[%s6293_s1 + $0x68] sm:$0xff] }
 0x475   : > { %4384 = vmatprep.subr.bf16.mxu0 %v4929_v48  ;;  %v4412_v22 = vpack.c.bf16 %v2466_v21, %v2465_v41  ;;  %v2536_v41 = vld [vmem:[%s6293_s1 + $0x278] sm:$0xff] }
 0x478   : > { %4386 = vmatpush3.bf16.msra.mxu0 %v4385_v46  ;;  %v2467_v46 = vld [vmem:[%s6293_s1 + $0x50] sm:$0xff] }
 0x479   : > { %4387 = vmatprep.subr.bf16.mxu0 %v4929_v48  ;;  %v4415_v23 = vpack.c.bf16 %v2468_v31, %v2467_v46 }
 0x47c   : > { %4389 = vmatpush3.bf16.msra.mxu0 %v4388_v24  ;;  %v2469_v24 = vld [vmem:[%s6293_s1 + $0x60] sm:$0xff] }
 0x47d   : > { %4390 = vmatprep.subr.bf16.mxu0 %v4929_v48  ;;  %v4418_v47 = vpack.c.bf16 %v2470_v63, %v2469_v24 }
 0x480   : > { %4392 = vmatpush3.bf16.msra.mxu0 %v4391_v1  ;;  %v2471_v1 = vld [vmem:[%s6293_s1 + $0x70] sm:$0xff] }
 0x481   : > { %4393 = vmatprep.subr.bf16.mxu0 %v4929_v48  ;;  %v4421_v26 = vpack.c.bf16 %v2472_v25, %v2471_v1 }
 0x484   : > { %4395 = vmatpush3.bf16.msra.mxu0 %v4394_v27  ;;  %v2489_v27 = vld [vmem:[%s6293_s1 + $0x100] sm:$0xff] }
 0x485   : > { %4396 = vmatprep.subr.bf16.mxu0 %v4929_v48  ;;  %v4448_v30 = vpack.c.bf16 %v2490_v28, %v2489_v27 }
 0x488   : > { %4398 = vmatpush3.bf16.msra.mxu0 %v4397_v60  ;;  %v2503_v60 = vld [vmem:[%s6293_s1 + $0x170] sm:$0xff] }
 0x489   : > { %4399 = vmatprep.subr.bf16.mxu0 %v4929_v48  ;;  %v4469_v59 = vpack.c.bf16 %v2504_v61, %v2503_v60 }
 0x53e   : > { %v3590_v4 = vpop.f32.mrb[64].mxu0 }
 0x53f   : > { %v3591_v2 = vpop.f32.mrb[65].mxu0 }
 0x540   : > { %v3592_v6 = vadd.f32 %v3591_v2, %v3590_v4  ;;  %v2523_v4 = vld [vmem:[%s6293_s1 + $0x210] sm:$0xff]  ;;  %v2524_v2 = vld [vmem:[%s6293_s1 + $0x218] sm:$0xff] }
 0x542   : > { %4071 = vmatmul.mubr.f32.vlgmr.msra.gmra.mrb[70].mxu0 %v3592_v6  ;;  %v3593_v7 = vpop.f32.mrb[66].mxu0  ;;  %4153 = vmatmul.mubr.f32.vlgmr.msra.gmra.mrb[32].mxu1 %v3592_v6  ;;  %v2525_v6 = vld [vmem:[%s6293_s1 + $0x220] sm:$0xff] }
 0x543   : > { %4401 = vmatpush3.bf16.msra.mxu0 %v4400_v5  ;;  %v3594_v11 = vpop.f32.mrb[67].mxu0  ;;  %4073 = vmatprep.mubr.msk.f32.mxu0 %vm4930_vm9, %v4927_v35  ;;  %v4475_v5 = vpack.c.bf16 %v2524_v2, %v2523_v4  ;;  %v4478_v9 = vpack.c.bf16 %v2526_v8, %v2525_v6 }
 0x544   : > { %4402 = vmatprep.subr.bf16.mxu0 %v4929_v48  ;;  %v3595_v12 = vadd.f32 %v3594_v11, %v3593_v7  ;;  %4155 = vmatprep.mubr.msk.f32.mxu1 %vm4930_vm9, %v4927_v35  ;;  %v2527_v7 = vld [vmem:[%s6293_s1 + $0x230] sm:$0xff] }
 0x545   : > { %4473 = vmatpush3.bf16.msra.mxu1 %v4472_v3  ;;  %v3331_v3 = vld [vmem:[%s6294_s19] ss:$0 sm:$0xff] }
 0x546   : > { %v3596_v15 = vpop.f32.mrb[68].mxu0  ;;  %4074 = vmatmul.mubr.f32.gmra.mrb[72].mxu0 %v3595_v12  ;;  %4156 = vmatmul.mubr.f32.gmra.mrb[34].mxu1 %v3595_v12  ;;  %v4484_v12 = vpack.c.bf16 %v2530_v14, %v2529_v13 }
 0x547   : > { %4404 = vmatpush3.bf16.msra.mxu0 %v4403_v10  ;;  %v3597_v49 = vpop.f32.mrb[69].mxu0  ;;  %4076 = vmatprep.mubr.msk.f32.mxu0 %vm4930_vm9, %v4927_v35  ;;  %v2528_v10 = vld [vmem:[%s6293_s1 + $0x238] sm:$0xff] }
 0x548   : > { %4405 = vmatprep.subr.bf16.mxu0 %v4929_v48  ;;  %v3598_v19 = vadd.f32 %v3597_v49, %v3596_v15  ;;  %4158 = vmatprep.mubr.msk.f32.mxu1 %vm4930_vm9, %v4927_v35  ;;  %v4481_v11 = vpack.c.bf16 %v2528_v10, %v2527_v7  ;;  %v2531_v15 = vld [vmem:[%s6293_s1 + $0x250] sm:$0xff] }
 0x549   : > { %4474 = vmatprep.subr.bf16.mxu1 %v4929_v48 }
 0x54a   : > { %4077 = vmatmul.mubr.f32.gmra.mrb[74].mxu0 %v3598_v19  ;;  %4159 = vmatmul.mubr.f32.gmra.mrb[36].mxu1 %v3598_v19  ;;  %v4490_v19 = vpack.c.bf16 %v2534_v18, %v2533_v17 }
 0x54b   : > { %4407 = vmatpush3.bf16.msra.mxu0 %v4406_v16  ;;  %4111 = vmatprep.mubr.msk.f32.mxu0 %vm4930_vm9, %v4927_v35  ;;  %v2532_v16 = vld [vmem:[%s6293_s1 + $0x258] sm:$0xff] }
 0x54c   : > { %4408 = vmatprep.subr.bf16.mxu0 %v4929_v48  ;;  %4234 = vmatprep.mubr.msk.f32.mxu1 %vm4930_vm9, %v4927_v35  ;;  %v4487_v49 = vpack.c.bf16 %v2532_v16, %v2531_v15  ;;  %v3336_v16 = vld [vmem:[%s6294_s19 + $0x2] ss:$0 sm:$0xff] }
 0x54d   : > { %4476 = vmatpush3.bf16.msra.mxu1 %v4475_v5 }
 0x54e   : > { %4477 = vmatprep.subr.bf16.mxu1 %v4929_v48 }
 0x54f   : > { %4410 = vmatpush3.bf16.msra.mxu0 %v4409_v20  ;;  %v2535_v20 = vld [vmem:[%s6293_s1 + $0x270] sm:$0xff] }
 0x550   : > { %4411 = vmatprep.subr.bf16.mxu0 %v4929_v48  ;;  %v4493_v21 = vpack.c.bf16 %v2536_v41, %v2535_v20 }
 0x551   : > { %4479 = vmatpush3.bf16.msra.mxu1 %v4478_v9 }
 0x552   : > { %4480 = vmatprep.subr.bf16.mxu1 %v4929_v48 }
 0x553   : > { %4413 = vmatpush3.bf16.msra.mxu0 %v4412_v22 }
 0x554   : > { %4414 = vmatprep.subr.bf16.mxu0 %v4929_v48 }
 0x555   : > { %4482 = vmatpush3.bf16.msra.mxu1 %v4481_v11 }
 0x556   : > { %4483 = vmatprep.subr.bf16.mxu1 %v4929_v48 }
 0x557   : > { %4416 = vmatpush3.bf16.msra.mxu0 %v4415_v23 }
 0x558   : > { %4417 = vmatprep.subr.bf16.mxu0 %v4929_v48 }
 0x559   : > { %4485 = vmatpush3.bf16.msra.mxu1 %v4484_v12 }
 0x55a   : > { %4486 = vmatprep.subr.bf16.mxu1 %v4929_v48 }
 0x55b   : > { %4419 = vmatpush3.bf16.msra.mxu0 %v4418_v47 }
 0x55c   : > { %4420 = vmatprep.subr.bf16.mxu0 %v4929_v48 }
 0x55d   : > { %4488 = vmatpush3.bf16.msra.mxu1 %v4487_v49 }
 0x55e   : > { %4489 = vmatprep.subr.bf16.mxu1 %v4929_v48 }
 0x55f   : > { %4422 = vmatpush3.bf16.msra.mxu0 %v4421_v26 }
 0x560   : > { %4447 = vmatprep.subr.bf16.mxu0 %v4929_v48 }
 0x561   : > { %4491 = vmatpush3.bf16.msra.mxu1 %v4490_v19 }
 0x562   : > { %4112 = vmatmul.mubr.f32.vlgmr.msra.gmra.mrb[76].mxu0 %v6009_v29  ;;  %4492 = vmatprep.subr.bf16.mxu1 %v4929_v48 }
 0x563   : > { %4449 = vmatpush3.bf16.msra.mxu0 %v4448_v30  ;;  %4114 = vmatprep.mubr.msk.f32.mxu0 %vm4930_vm9, %v4927_v35 }
 0x564   : > { %4450 = vmatprep.subr.bf16.mxu0 %v4929_v48 }
 0x565   : > { %4494 = vmatpush3.bf16.msra.mxu1 %v4493_v21 }
 0x566   : > { %4115 = vmatmul.mubr.f32.gmra.mrb[78].mxu0 %v6022_v37 }
 0x567   : > { %4452 = vmatpush3.bf16.msra.mxu0 %v4451_v36  ;;  %4117 = vmatprep.mubr.msk.f32.mxu0 %vm4930_vm9, %v4927_v35 }
 0x568   : > { %4453 = vmatprep.subr.bf16.mxu0 %v4929_v48 }
 0x56a   : > { %4118 = vmatmul.mubr.f32.gmra.mrb[80].mxu0 %v6035_v42 }
 0x56b   : > { %4455 = vmatpush3.bf16.msra.mxu0 %v4454_v40  ;;  %4193 = vmatprep.mubr.msk.f32.mxu0 %vm4930_vm9, %v4927_v35 }
 0x56c   : > { %4456 = vmatprep.subr.bf16.mxu0 %v4929_v48 }
 0x56f   : > { %4458 = vmatpush3.bf16.msra.mxu0 %v4457_v45 }
 0x570   : > { %4459 = vmatprep.subr.bf16.mxu0 %v4929_v48 }
 0x573   : > { %4461 = vmatpush3.bf16.msra.mxu0 %v4460_v52 }
 0x574   : > { %4462 = vmatprep.subr.bf16.mxu0 %v4929_v48 }
 0x577   : > { %4464 = vmatpush3.bf16.msra.mxu0 %v4463_v56 }
 0x578   : > { %4465 = vmatprep.subr.bf16.mxu0 %v4929_v48 }
 0x57b   : > { %4467 = vmatpush3.bf16.msra.mxu0 %v4466_v58 }
 0x57c   : > { %4468 = vmatprep.subr.bf16.mxu0 %v4929_v48 }
 0x57f   : > { %4470 = vmatpush3.bf16.msra.mxu0 %v4469_v59 }
 0x582   : > { %4194 = vmatmul.mubr.f32.vlgmr.msra.gmra.mrb[82].mxu0 %v6009_v29 }
 0x583   : > { %4196 = vmatprep.mubr.msk.f32.mxu0 %vm4930_vm9, %v4927_v35 }
 0x586   : > { %4197 = vmatmul.mubr.f32.gmra.mrb[84].mxu0 %v6022_v37 }
 0x587   : > { %4199 = vmatprep.mubr.msk.f32.mxu0 %vm4930_vm9, %v4927_v35 }
 0x58a   : > { %4200 = vmatmul.mubr.f32.gmra.mrb[86].mxu0 %v6035_v42 }
 0x615   : > { %v2608_v22 = vpop.f32.mrb[70].mxu0  ;;  %v2793_v46 = vpop.f32.mrb[32].mxu1 }
 0x616   : > { %v4072_v31 = vpop.f32.mrb[71].mxu0  ;;  %v4154_v23 = vpop.f32.mrb[33].mxu1 }
 0x619   : > { %v2613_v24 = vpop.f32.mrb[72].mxu0  ;;  %v2798_v63 = vpop.f32.mrb[34].mxu1 }
 0x61a   : > { %v4075_v47 = vpop.f32.mrb[73].mxu0  ;;  %v4157_v1 = vpop.f32.mrb[35].mxu1 }
 0x61d   : > { %v2618_v25 = vpop.f32.mrb[74].mxu0  ;;  %v2803_v48 = vpop.f32.mrb[36].mxu1 }
 0x61e   : > { %v4078_v26 = vpop.f32.mrb[75].mxu0  ;;  %v4160_v27 = vpop.f32.mrb[37].mxu1 }
 0x635   : > { %v2688_v28 = vpop.f32.mrb[76].mxu0 }
 0x636   : > { %v2689_v30 = vadd.f32 %v2688_v28, %v2608_v22  ;;  %v4113_v33 = vpop.f32.mrb[77].mxu0 }
 0x638   : > { %v2706_v4 = vadd.f32 %v3331_v3, %v2689_v30 }
 0x639   : > { %v2693_v34 = vpop.f32.mrb[78].mxu0 }
 0x63a   : > { %v2694_v36 = vadd.f32 %v2693_v34, %v2613_v24  ;;  %v4116_v38 = vpop.f32.mrb[79].mxu0  ;;  %v3332_v2 = vmul.f32 -1.442695, %v2706_v4 }
 0x63b   : > { %v3337_v38 = vsel %vm2993_vm10, 1.0, %v4927_v35 }
 0x63c   : > { %v2707_v5 = vadd.f32 %v3331_v3, %v2694_v36  ;;  %4695 = vpow2.f32 %v3332_v2  ;;  %v3339_v2 = vld [vmem:[%s6294_s19 + $0x4] ss:$0 sm:$0xff] }
 0x63d   : > { %v2698_v39 = vpop.f32.mrb[80].mxu0 }
 0x63e   : > { %v2699_v40 = vadd.f32 %v2698_v39, %v2618_v25  ;;  %v4119_v43 = vpop.f32.mrb[81].mxu0  ;;  %v3333_v6 = vmul.f32 -1.442695, %v2707_v5 }
 0x640   : > { %v2708_v8 = vadd.f32 %v3331_v3, %v2699_v40  ;;  %4697 = vpow2.f32 %v3333_v6  ;;  %v3338_v3 = vld [vmem:[%s6294_s19 + $0x3] ss:$0 sm:$0xff] }
 0x642   : > { %v3334_v9 = vmul.f32 -1.442695, %v2708_v8 }
 0x644   : > { %4699 = vpow2.f32 %v3334_v9 }
 0x646   : > { %v4696_v7 = vpop.eup %4695 }
 0x647   : > { %v2718_v10 = vadd.f32 1.0, %v4696_v7 }
 0x649   : > { %4701 = vrcp.f32 %v2718_v10 }
 0x64a   : > { %v4698_v11 = vpop.eup %4697 }
 0x64b   : > { %v2719_v13 = vadd.f32 1.0, %v4698_v11 }
 0x64d   : > { %4703 = vrcp.f32 %v2719_v13 }
 0x64e   : > { %v4700_v14 = vpop.eup %4699 }
 0x64f   : > { %v2720_v12 = vadd.f32 1.0, %v4700_v14 }
 0x651   : > { %4705 = vrcp.f32 %v2720_v12 }
 0x653   : > { %v4702_v15 = vpop.eup %4701 }
 0x654   : > { %v2984_v49 = vsub.f32 1.0, %v4702_v15 }
 0x655   : > { %v2873_v45 = vpop.f32.mrb[82].mxu0 }
 0x656   : > { %v2874_v50 = vadd.f32 %v2873_v45, %v2793_v46  ;;  %v4195_v51 = vpop.f32.mrb[83].mxu0  ;;  %v2987_v21 = vmul.f32 %v2984_v49, %v6009_v29 }
 0x657   : > { %v4704_v17 = vpop.eup %4703 }
 0x658   : > { %v2891_v52 = vadd.f32 %v3335_v44, %v2874_v50  ;;  %v2985_v22 = vsub.f32 1.0, %v4704_v17 }
 0x659   : > { %v2878_v53 = vpop.f32.mrb[84].mxu0 }
 0x65a   : > { %v2894_v55 = vmax.f32 %v2891_v52, 0.0  ;;  %v2879_v56 = vadd.f32 %v2878_v53, %v2798_v63  ;;  %v4198_v54 = vpop.f32.mrb[85].mxu0  ;;  %v2988_v1 = vmul.f32 %v2985_v22, %v6022_v37 }
 0x65b   : > { %v4706_v46 = vpop.eup %4705 }
 0x65c   : > { %v2892_v57 = vadd.f32 %v3335_v44, %v2879_v56  ;;  %4235 = vmatmul.mubr.f32.vlgmr.msra.gmra.mrb[38].mxu1 %v2894_v55  ;;  %v2986_v25 = vsub.f32 1.0, %v4706_v46 }
 0x65d   : > { %v2883_v58 = vpop.f32.mrb[86].mxu0  ;;  %4237 = vmatprep.mubr.msk.f32.mxu1 %vm4930_vm9, %v4927_v35 }
 0x65e   : > { %v2895_v60 = vmax.f32 %v2892_v57, 0.0  ;;  %v2884_v61 = vadd.f32 %v2883_v58, %v2803_v48  ;;  %v4201_v59 = vpop.f32.mrb[87].mxu0  ;;  %v2989_v33 = vmul.f32 %v2986_v25, %v6035_v42 }
 0x660   : > { %v2893_v62 = vadd.f32 %v3335_v44, %v2884_v61  ;;  %4238 = vmatmul.mubr.f32.gmra.mrb[40].mxu1 %v2895_v60 }
 0x661   : > { %4240 = vmatprep.mubr.msk.f32.mxu1 %vm4930_vm9, %v4927_v35 }
 0x662   : > { %v2896_v0 = vmax.f32 %v2893_v62, 0.0 }
 0x664   : > { %4241 = vmatmul.mubr.f32.gmra.mrb[42].mxu1 %v2896_v0 }
 0x72f   : > { %v2967_v18 = vpop.f32.mrb[38].mxu1 }
 0x730   : > { %v2968_v19 = vadd.f32 %v3336_v16, %v2967_v18  ;;  %v4236_v20 = vpop.f32.mrb[39].mxu1 }
 0x732   : > { %v2981_v41 = vmul.f32 %v4702_v15, %v2968_v19 }
 0x733   : > { %v2972_v31 = vpop.f32.mrb[40].mxu1 }
 0x734   : > { %v2973_v23 = vadd.f32 %v3336_v16, %v2972_v31  ;;  %v4239_v24 = vpop.f32.mrb[41].mxu1  ;;  %v2990_v63 = vadd.f32 %v2987_v21, %v2981_v41 }
 0x736   : > { %v2982_v47 = vmul.f32 %v4704_v17, %v2973_v23  ;;  %2996 = vadd.xlane.f32.xlu0 %v2990_v63 }
 0x737   : > { %v2977_v48 = vpop.f32.mrb[42].mxu1 }
 0x738   : > { %v2978_v26 = vadd.f32 %v3336_v16, %v2977_v48  ;;  %v4242_v27 = vpop.f32.mrb[43].mxu1  ;;  %v2991_v28 = vadd.f32 %v2988_v1, %v2982_v47 }
 0x73a   : > { %v2983_v30 = vmul.f32 %v4706_v46, %v2978_v26  ;;  %2998 = vadd.xlane.f32.xlu1 %v2991_v28 }
 0x73c   : > { %v2992_v29 = vadd.f32 %v2989_v33, %v2983_v30 }
 0x73e   : > { %3000 = vadd.xlane.f32.xlu0 %v2992_v29 }
 0x7c3   : > { %v2997_v34 = vpop.xlane.xlu0 %2996 }
 0x7c4   : > { %v3002_v36 = vmul.f32 0.03125, %v2997_v34 }
 0x7c6   : > { %v3005_v39 = vsub.f32 %v2990_v63, %v3002_v36 }
 0x7c7   : > { %v2999_v40 = vpop.xlane.xlu1 %2998 }
 0x7c8   : > { %v3003_v37 = vmul.f32 0.03125, %v2999_v40  ;;  %v3008_v43 = vmul.f32 %v3337_v38, %v3005_v39 }
 0x7ca   : > { %v3006_v44 = vsub.f32 %v2991_v28, %v3003_v37  ;;  %v3011_v45 = vmul.f32 %v3008_v43, %v3008_v43 }
 0x7cb   : > { %v3001_v50 = vpop.xlane.xlu0 %3000 }
 0x7cc   : > { %v3004_v51 = vmul.f32 0.03125, %v3001_v50  ;;  %3014 = vadd.xlane.f32.xlu0 %v3011_v45  ;;  %v3009_v52 = vmul.f32 %v3337_v38, %v3006_v44 }
 0x7ce   : > { %v3007_v53 = vsub.f32 %v2992_v29, %v3004_v51  ;;  %v3012_v42 = vmul.f32 %v3009_v52, %v3009_v52 }
 0x7d0   : > { %3016 = vadd.xlane.f32.xlu1 %v3012_v42  ;;  %v3010_v55 = vmul.f32 %v3337_v38, %v3007_v53 }
 0x7d2   : > { %v3013_v32 = vmul.f32 %v3010_v55, %v3010_v55 }
 0x7d4   : > { %3018 = vadd.xlane.f32.xlu0 %v3013_v32 }
 0x859   : > { %v3015_v56 = vpop.xlane.xlu0 %3014 }
 0x85a   : > { %v3020_v54 = vmul.f32 0.03125, %v3015_v56 }
 0x85c   : > { %v3023_v35 = vadd.f32 1e-05, %v3020_v54 }
 0x85d   : > { %v3017_v57 = vpop.xlane.xlu1 %3016 }
 0x85e   : > { %4707 = vrsqrt.f32 %v3023_v35  ;;  %v3021_v58 = vmul.f32 0.03125, %v3017_v57 }
 0x860   : > { %v3024_v60 = vadd.f32 1e-05, %v3021_v58 }
 0x861   : > { %v3019_v61 = vpop.xlane.xlu0 %3018 }
 0x862   : > { %4709 = vrsqrt.f32 %v3024_v60  ;;  %v3022_v59 = vmul.f32 0.03125, %v3019_v61 }
 0x864   : > { %v3025_v62 = vadd.f32 1e-05, %v3022_v59 }
 0x866   : > { %4711 = vrsqrt.f32 %v3025_v62 }
 0x868   : > { %v4708_v0 = vpop.eup %4707 }
 0x869   : > { %v3029_v4 = vmul.f32 %v4708_v0, %v3008_v43 }
 0x86b   : > { %v3036_v5 = vmul.f32 %v3338_v3, %v3029_v4 }
 0x86c   : > { %v4710_v6 = vpop.eup %4709 }
 0x86d   : > { %v3043_v8 = vadd.f32 %v3339_v2, %v3036_v5  ;;  %v3030_v9 = vmul.f32 %v4710_v6, %v3009_v52 }
 0x86f   : > { %v3037_v7 = vmul.f32 %v3338_v3, %v3030_v9  ;;  %3046 = vst [vmem:[%s485_s15] sm:$0xff] %v3043_v8 }
 0x870   : > { %v4712_v10 = vpop.eup %4711 }
 0x871   : > { %v3044_v11 = vadd.f32 %v3339_v2, %v3037_v7  ;;  %v3031_v13 = vmul.f32 %v4712_v10, %v3010_v55 }
 0x873   : > { %v3038_v14 = vmul.f32 %v3338_v3, %v3031_v13  ;;  %3047 = vst [vmem:[%s485_s15 + $0x8] sm:$0xff] %v3044_v11 }
 0x875   : > { %v3045_v12 = vadd.f32 %v3339_v2, %v3038_v14 }
 0x877   : > { %3048 = vst [vmem:[%s485_s15 + $0x10] sm:$0xff] %v3045_v12 }
 0x878   : > { %4796 = shalt.err (!%p4793_p7)
}
 0x879   : > { %s4797_s3 = scalar_lea.hbm %s6167_s18, 384  ;;  %s4801_s7 = scalar_lea.hbm %s6295_s8, 768 }
 0x87a   : > { %p4798_p8 = scmp.ne.s32.totalorder %s6167_s18, %s4797_s3  ;;  %p4802_p10 = scmp.lt.u32.totalorder %s6167_s18, %s6295_s8 }
 0x87b   : > { %p4803_p9 = scmp.lt.u32.totalorder %s4801_s7, %s4797_s3  ;;  %p4805_p0 = scmp.lt.u32.totalorder %s4797_s3, %s6167_s18 }
 0x87c   : > { %p4799_p1 = pnand %p4798_p8, %p6296_p12 }
 0x87d   : > { %p4804_p5 = por %p4803_p9, %p4802_p10 }
 0x87e   : > { %p4800_p2 = pneg %p4799_p1 }
 0x87f   : > { %p4806_p3 = por %p4805_p0, %p4804_p5 }
 0x881   : > { %p4807_p11 = pnand %p4806_p3, %p4800_p2 }
 0x883   : > { %4810 = shalt.err (!%p4807_p11)
}
 0x884   : > { %s4932_s11 = smov 128   ;;  %s4933_s28 = smov 8  }
 0x885   : > { %4568 = dma.vmem_to_hbm [thread:$0]  (%p6296_p12), %s6169_s30, 384, %s6167_s18, %s6171_s21, %s4932_s11, %s4932_s11, %s4933_s28  }
 0x886 PF: > { %s3078_s22 = sand.u32 1, %s4875_s23   ;;  %p6297_p6 = scmp.ne.s32.totalorder %s6282_s9, 0 }
 0x887   : > { %p6298_p4 = scmp.ge.s32.totalorder %s4919_s13, 2  ;;  %s3079_s12 = scalar_lea.sflag [#allocation7], %s3078_s22 }
 0x889   : > { %p4582_p13 = pnand %p6298_p4, %p6297_p6 }
 0x88b   : > { %4870 = dma.done.wait (!%p4582_p13), %s3079_s12, 384  }
 0x88c   : > { %4872 = vsyncadd (!%p4582_p13), %s3079_s12, 4294966912  ;;  %s33_s13 = sadd.s32 1, %s4919_s13   ;;  %s6299_s16 = sld [smem:[#allocation19_spill]] }
 0x88d   : > { %p30_p7 = scmp.ge.s32.totalorder %s33_s13, 4   ;;  %s6300_s30 = sld [smem:[#allocation22_spill]] }
 0x88e   : > { %s6301_s11 = sld [smem:[#allocation20_spill]]  ;;  %s6302_s12 = sld [smem:[#allocation21_spill]] }
 0x88f   : > { %s6303_s23 = smov %s4879_s24  ;;  %s6304_s24 = smov %s4883_s25 }
 0x890   : > { %s6305_s25 = smov %s5180_s26  ;;  %s6306_s26 = smov %s4891_s27 }
 0x891   : > { %s6307_s27 = smov %s4895_s0  ;;  %s6308_s0 = smov %s5189_s17 }
 0x892   : > { %s6309_s28 = smov %s4903_s29  ;;  %s6310_s29 = smov %s6299_s16 }
 0x893   :  { %32 = sbr.rel (!%p30_p7) target bundleno = 26 (0x1a), region = 131 }
 0x89a   :  { %3084 = vsyncpa [#allocation6], 1 }
 0x89b   :  { %3086 = vsyncpa [#allocation6 + $0x1], 1 }
 0x89c   :  { %3087 = vsyncpa [#allocation9], 1 }
 0x89d   :  { %3089 = vsyncpa [#allocation9 + $0x1], 1 }
 0x89e   :  { %3090 = vsyncpa [#allocation7], 1 }
 0x89f   :  { %3092 = vsyncpa [#allocation7 + $0x1], 1 }

</bundles_post_ra>
